<compile_context>
chip_gen: v6e
topology: v6e:2x2x1
jax: 0.10.0
libtpu: 0.0.40
codegen_flags: <defaults>
</compile_context>

<pallas_src>
import functools

import jax
import jax.numpy as jnp
from jax.experimental import pallas as pl
from jax.experimental.pallas import tpu as pltpu

EPS = 1e-3


def _make_conv_bn_kernel(m_true, mp):
    """Fused 1x1-conv + train-mode BatchNorm kernel factory.

    Grid = (Cout_blocks, K_blocks).  The f32 output tile is resident across
    the K (reduction) axis and doubles as the accumulator; the BN epilogue is
    applied in place on the last K step.  Columns [m_true, mp) are zero after
    the matmul (zero-padded activations) and are masked out of the variance.
    """
    inv_m = 1.0 / float(m_true)
    needs_mask = mp != m_true

    def kernel(w_ref, x_ref, gb_ref, o_ref):
        # w_ref: (TCO, TK)  x_ref: (TK, MP)  gb_ref: (TCO, 2)  o_ref: (TCO, MP) f32
        k = pl.program_id(1)

        @pl.when(k == 0)
        def _():
            o_ref[...] = jnp.zeros_like(o_ref)

        o_ref[...] += jnp.dot(
            w_ref[...], x_ref[...], preferred_element_type=jnp.float32
        )

        @pl.when(k == pl.num_programs(1) - 1)
        def _():
            y = o_ref[...]                              # (TCO, MP) f32
            gamma = gb_ref[:, 0:1]                      # (TCO, 1)
            beta = gb_ref[:, 1:2]                       # (TCO, 1)
            # Training-mode BN: biased stats over the true M = N*H*W columns.
            mean = jnp.sum(y, axis=1, keepdims=True) * inv_m
            centered = y - mean
            if needs_mask:
                col = jax.lax.broadcasted_iota(jnp.int32, y.shape, 1)
                centered = jnp.where(col < m_true, centered, 0.0)
            var = jnp.sum(centered * centered, axis=1, keepdims=True) * inv_m
            scale = jax.lax.rsqrt(var + EPS) * gamma    # fold gamma into scale
            o_ref[...] = centered * scale + beta

    return kernel


def _pick_tk(cin, target):
    """K-tile: must divide Cin and be a multiple of 128 (weight lane dim)."""
    if target is not None and cin % target == 0 and target % 128 == 0:
        return target
    for cand in (1152, 1024, 768, 640, 512, 384, 256, 128):
        if cand <= cin and cin % cand == 0:
            return cand
    return cin  # single K step; full-dim block is always legal


def _pick_tco(cout, blocks):
    if blocks > 1 and cout % blocks == 0 and (cout // blocks) % 8 == 0:
        return cout // blocks
    return cout


def conv2d_1x1_batchnorm(x_nchw, weight_oi, gamma, beta, *,
                         matmul_dtype=jnp.bfloat16, tk=1152, cout_blocks=2):
    """x_nchw: (N, Cin, H, W); weight_oi: (Cout, Cin); gamma/beta: (Cout,)."""
    n, cin, h, w = x_nchw.shape
    cout = weight_oi.shape[0]
    m = n * h * w
    mp = ((m + 127) // 128) * 128          # lane-dense padded column count

    if n == 1:
        x_cm = x_nchw.reshape(cin, m)      # metadata-only reshape for NCHW, N=1
    else:
        # TODO(synk): for N>1 this transpose moves data; BN stats still span
        # the full N*H*W axis so the kernel stays correct.
        x_cm = jnp.transpose(x_nchw, (1, 0, 2, 3)).reshape(cin, m)

    x_cm = x_cm.astype(matmul_dtype)
    if mp != m:
        x_cm = jnp.pad(x_cm, ((0, 0), (0, mp - m)))   # zero cols -> zero conv output
    w_cm = weight_oi.astype(matmul_dtype)             # (Cout, Cin) LHS, no transpose
    gb = jnp.stack([gamma, beta], axis=1).astype(jnp.float32)   # (Cout, 2)

    tk = _pick_tk(cin, tk)
    tco = _pick_tco(cout, cout_blocks)
    grid = (cout // tco, cin // tk)

    op_bytes = jnp.dtype(matmul_dtype).itemsize
    cost = pl.CostEstimate(
        flops=2 * cout * cin * m,
        transcendentals=0,
        bytes_accessed=(cout * cin * op_bytes      # weight stream
                        + cin * mp * op_bytes      # activations
                        + cout * mp * 4            # f32 output
                        + cout * 2 * 4),           # packed gamma/beta
    )

    out_cm = pl.pallas_call(
        _make_conv_bn_kernel(m, mp),
        out_shape=jax.ShapeDtypeStruct((cout, mp), jnp.float32),
        grid_spec=pltpu.PrefetchScalarGridSpec(
            num_scalar_prefetch=0,
            grid=grid,
            in_specs=[
                pl.BlockSpec((tco, tk), lambda co, k: (co, k)),   # weight tile
                pl.BlockSpec((tk, mp), lambda co, k: (k, 0)),     # activation K tile
                pl.BlockSpec((tco, 2), lambda co, k: (co, 0)),    # packed gamma/beta
            ],
            out_specs=pl.BlockSpec((tco, mp), lambda co, k: (co, 0)),
        ),
        compiler_params=pltpu.CompilerParams(
            dimension_semantics=("parallel", "arbitrary"),   # Cout parallel, K reduction
        ),
        cost_estimate=cost,
    )(w_cm, x_cm, gb)

    if mp != m:
        out_cm = out_cm[:, :m]
    if n == 1:
        return out_cm.reshape(1, cout, h, w)
    return jnp.transpose(out_cm.reshape(cout, n, h, w), (1, 0, 2, 3))


def _reference(x_nchw, weight_oi, gamma, beta):
    # Pure-JAX reference (f32) for correctness checks.
    n, cin, h, w = x_nchw.shape
    cout = weight_oi.shape[0]
    xf = jnp.transpose(x_nchw, (0, 2, 3, 1)).reshape(-1, cin)
    y = xf @ weight_oi.T
    mean = jnp.mean(y, axis=0, keepdims=True)
    var = jnp.mean((y - mean) ** 2, axis=0, keepdims=True)
    y = (y - mean) / jnp.sqrt(var + EPS) * gamma[None, :] + beta[None, :]
    return jnp.transpose(y.reshape(n, h, w, cout), (0, 3, 1, 2))


if __name__ == "__main__":
    key = jax.random.PRNGKey(0)
    k_x, k_w, k_g, k_b = jax.random.split(key, 4)

    N, CIN, H, W = 1, 2304, 7, 7
    COUT = 384

    x = jax.random.normal(k_x, (N, CIN, H, W), dtype=jnp.float32)
    # Conv2d weight (Cout, Cin, 1, 1) stored as (Cout, Cin); Kaiming-ish scale.
    weight = jax.random.normal(k_w, (COUT, CIN), dtype=jnp.float32) * (1.0 / jnp.sqrt(CIN))
    gamma = 1.0 + 0.1 * jax.random.normal(k_g, (COUT,), dtype=jnp.float32)
    beta = 0.1 * jax.random.normal(k_b, (COUT,), dtype=jnp.float32)

    ref = _reference(x, weight, gamma, beta)

    # Default path: bf16 operands, f32 accumulation + f32 BN math.
    out = jax.block_until_ready(conv2d_1x1_batchnorm(x, weight, gamma, beta))
    assert out.shape == (N, COUT, H, W), out.shape
    assert jnp.allclose(out, ref, atol=1e-1, rtol=1e-1), float(jnp.max(jnp.abs(out - ref)))

    # f32-operand path: matches the PyTorch numerics at tight tolerance.
    out_f32 = jax.block_until_ready(
        conv2d_1x1_batchnorm(x, weight, gamma, beta, matmul_dtype=jnp.float32)
    )
    assert out_f32.shape == (N, COUT, H, W), out_f32.shape
    assert jnp.allclose(out_f32, ref, atol=1e-3, rtol=1e-3), float(jnp.max(jnp.abs(out_f32 - ref)))

    print("KERNEL_OK")
</pallas_src>

<mosaic_0001>
module attributes {stable_mosaic.version = 11 : i64} {
  func.func @kernel(%arg0: i32, %arg1: i32, %arg2: memref<192x1152xbf16, #tpu.memory_space<vmem>>, %arg3: memref<1152x128xbf16, #tpu.memory_space<vmem>>, %arg4: memref<192x2xf32, #tpu.memory_space<vmem>>, %arg5: memref<192x128xf32, #tpu.memory_space<vmem>>) attributes {dimension_semantics = [#tpu.dimension_semantics<parallel>, #tpu.dimension_semantics<arbitrary>], iteration_bounds = array<i64: 2, 2>, scalar_prefetch = 0 : i64, scratch_operands = 0 : i64, tpu.core_type = #tpu.core_type<tc>, window_params = [{transform_indices = @transform_0, window_bounds = array<i64: 192, 1152>}, {transform_indices = @transform_1, window_bounds = array<i64: 1152, 128>}, {transform_indices = @transform_2, window_bounds = array<i64: 192, 2>}, {transform_indices = @transform_3, window_bounds = array<i64: 192, 128>}]} {
    %c0_i32 = arith.constant 0 : i32
    %0 = arith.cmpi eq, %arg1, %c0_i32 : i32
    %1 = arith.extui %0 : i1 to i32
    %c0_i32_0 = arith.constant 0 : i32
    %2 = arith.cmpi ne, %1, %c0_i32_0 : i32
    scf.if %2 {
      %cst_9 = arith.constant 0.000000e+00 : f32
      %12 = vector.broadcast %cst_9 : f32 to vector<192x128xf32>
      %c0_10 = arith.constant 0 : index
      %c0_11 = arith.constant 0 : index
      %13 = vector.load %arg5[%c0_10, %c0_11] : memref<192x128xf32, #tpu.memory_space<vmem>>, vector<192x128xf32>
      tpu.vector_store %arg5[%c0_10, %c0_11], %12 {strides = array<i32>} : memref<192x128xf32, #tpu.memory_space<vmem>>, vector<192x128xf32>,
    } else {
    }
    %c0 = arith.constant 0 : index
    %c0_1 = arith.constant 0 : index
    %3 = vector.load %arg5[%c0, %c0_1] : memref<192x128xf32, #tpu.memory_space<vmem>>, vector<192x128xf32>
    %c0_2 = arith.constant 0 : index
    %c0_3 = arith.constant 0 : index
    %4 = vector.load %arg2[%c0_2, %c0_3] : memref<192x1152xbf16, #tpu.memory_space<vmem>>, vector<192x1152xbf16>
    %c0_4 = arith.constant 0 : index
    %c0_5 = arith.constant 0 : index
    %5 = vector.load %arg3[%c0_4, %c0_5] : memref<1152x128xbf16, #tpu.memory_space<vmem>>, vector<1152x128xbf16>
    %cst = arith.constant dense<0.000000e+00> : vector<192x128xf32>
    %6 = tpu.matmul %4, %5, %cst {dimension_numbers = #tpu.dot_dimension_numbers<[1], [0], [0], [1], [0, 0, 1, 1], [], []>} : vector<192x1152xbf16>, vector<1152x128xbf16>, vector<192x128xf32> -> vector<192x128xf32>
    %7 = arith.addf %3, %6 : vector<192x128xf32>
    %c0_6 = arith.constant 0 : index
    %c0_7 = arith.constant 0 : index
    %8 = vector.load %arg5[%c0_6, %c0_7] : memref<192x128xf32, #tpu.memory_space<vmem>>, vector<192x128xf32>
    tpu.vector_store %arg5[%c0_6, %c0_7], %7 {strides = array<i32>} : memref<192x128xf32, #tpu.memory_space<vmem>>, vector<192x128xf32>,
    %c1_i32 = arith.constant 1 : i32
    %9 = arith.cmpi eq, %arg1, %c1_i32 : i32
    %10 = arith.extui %9 : i1 to i32
    %c0_i32_8 = arith.constant 0 : i32
    %11 = arith.cmpi ne, %10, %c0_i32_8 : i32
    scf.if %11 {
      %c0_9 = arith.constant 0 : index
      %c0_10 = arith.constant 0 : index
      %12 = vector.load %arg5[%c0_9, %c0_10] : memref<192x128xf32, #tpu.memory_space<vmem>>, vector<192x128xf32>
      %c0_11 = arith.constant 0 : index
      %c0_12 = arith.constant 0 : index
      %13 = vector.load %arg4[%c0_11, %c0_12] : memref<192x2xf32, #tpu.memory_space<vmem>>, vector<192x1xf32>
      %c0_13 = arith.constant 0 : index
      %c1 = arith.constant 1 : index
      %14 = vector.load %arg4[%c0_13, %c1] : memref<192x2xf32, #tpu.memory_space<vmem>>, vector<192x1xf32>
      %cst_14 = arith.constant dense<0.000000e+00> : vector<192xf32>
      %15 = vector.multi_reduction <add>, %12, %cst_14 [1] : vector<192x128xf32> to vector<192xf32>
      %16 = vector.shape_cast %15 : vector<192xf32> to vector<192x1xf32>
      %cst_15 = arith.constant 0.0204081628 : f32
      %17 = vector.broadcast %cst_15 : f32 to vector<192x1xf32>
      %18 = arith.mulf %16, %17 : vector<192x1xf32>
      %19 = vector.broadcast %18 : vector<192x1xf32> to vector<192x128xf32>
      %20 = arith.subf %12, %19 : vector<192x128xf32>
      %21 = tpu.iota {dimensions = array<i32: 1>} : vector<192x128xi32>
      %c49_i32 = arith.constant 49 : i32
      %22 = vector.broadcast %c49_i32 : i32 to vector<192x128xi32>
      %23 = arith.cmpi slt, %21, %22 : vector<192x128xi32>
      %cst_16 = arith.constant 0.000000e+00 : f32
      %24 = vector.broadcast %cst_16 : f32 to vector<192x128xf32>
      %25 = arith.select %23, %20, %24 : vector<192x128xi1>, vector<192x128xf32>
      %26 = arith.mulf %25, %25 : vector<192x128xf32>
      %cst_17 = arith.constant dense<0.000000e+00> : vector<192xf32>
      %27 = vector.multi_reduction <add>, %26, %cst_17 [1] : vector<192x128xf32> to vector<192xf32>
      %28 = vector.shape_cast %27 : vector<192xf32> to vector<192x1xf32>
      %cst_18 = arith.constant 0.0204081628 : f32
      %29 = vector.broadcast %cst_18 : f32 to vector<192x1xf32>
      %30 = arith.mulf %28, %29 : vector<192x1xf32>
      %cst_19 = arith.constant 1.000000e-03 : f32
      %31 = vector.broadcast %cst_19 : f32 to vector<192x1xf32>
      %32 = arith.addf %30, %31 : vector<192x1xf32>
      %33 = math.rsqrt %32 : vector<192x1xf32>
      %34 = arith.mulf %33, %13 : vector<192x1xf32>
      %35 = vector.broadcast %34 : vector<192x1xf32> to vector<192x128xf32>
      %36 = arith.mulf %25, %35 : vector<192x128xf32>
      %37 = vector.broadcast %14 : vector<192x1xf32> to vector<192x128xf32>
      %38 = arith.addf %36, %37 : vector<192x128xf32>
      %c0_20 = arith.constant 0 : index
      %c0_21 = arith.constant 0 : index
      %39 = vector.load %arg5[%c0_20, %c0_21] : memref<192x128xf32, #tpu.memory_space<vmem>>, vector<192x128xf32>
      tpu.vector_store %arg5[%c0_20, %c0_21], %38 {strides = array<i32>} : memref<192x128xf32, #tpu.memory_space<vmem>>, vector<192x128xf32>,
    } else {
    }
    return
  }
  func.func @transform_0(%arg0: i32, %arg1: i32) -> (i32, i32) {
    %c0_i32 = arith.constant 0 : i32
    return %arg0, %arg1 : i32, i32
  }
  func.func @transform_1(%arg0: i32, %arg1: i32) -> (i32, i32) {
    %c0_i32 = arith.constant 0 : i32
    %c0_i32_0 = arith.constant 0 : i32
    return %arg1, %c0_i32 : i32, i32
  }
  func.func @transform_2(%arg0: i32, %arg1: i32) -> (i32, i32) {
    %c0_i32 = arith.constant 0 : i32
    %c0_i32_0 = arith.constant 0 : i32
    return %arg0, %c0_i32 : i32, i32
  }
  func.func @transform_3(%arg0: i32, %arg1: i32) -> (i32, i32) {
    %c0_i32 = arith.constant 0 : i32
    %c0_i32_0 = arith.constant 0 : i32
    return %arg0, %c0_i32 : i32, i32
  }
}

</mosaic_0001>

<bundles_post_ra>
// kernel: tpu_custom_call.1
= control target key start
LH: loop header
LB: loop body
LE: loop exit
PB: predicated region body
PF: predicated region fallthrough
CT: control target
= control target key end

     0   :  { %s5575_s0 = inlined_call_operand.hbm [shape: bf16[384,2304], index: 0, kind: input, shape index: {}]   ;;  %s5576_s1 = inlined_call_operand.hbm [shape: bf16[2304,128], index: 1, kind: input, shape index: {}]   ;;  %s5577_s2 = inlined_call_operand.vmem [shape: f32[384,2], index: 2, kind: input, shape index: {}]   ;;  %s5578_s3 = inlined_call_operand.hbm [shape: f32[384,128], index: 3, kind: output, shape index: {}]  }
   0x1   :  { %5597 = sst [smem:[#allocation45_spill]] %s5575_s0 }
   0x2   :  { %5598 = sst [smem:[#allocation46_spill]] %s5577_s2 }
   0x3   :  { %5599 = sst [smem:[#allocation47_spill]] %s5578_s3 }
   0x4   :  { %8 = vsyncpa [#allocation3], 0 }
   0x5   :  { %10 = vsyncpa [#allocation3 + $0x1], 0 }
   0x6   :  { %11 = vsyncpa [#allocation6], 0 }
   0x7   :  { %13 = vsyncpa [#allocation6 + $0x1], 0 }
   0x8   :  { %14 = vsyncpa [#allocation4], 0 }
   0x9   :  { %16 = vsyncpa [#allocation4 + $0x1], 0  ;;  %s4349_s12 = smov 0   ;;  %s4351_s13 = smov 0  }
   0xa   :  { %s4353_s14 = smov 0   ;;  %s4355_s15 = smov 0  }
   0xb   :  { %s4357_s16 = smov 0   ;;  %s4359_s17 = smov 0  }
   0xc   :  { %s4361_s18 = smov 0   ;;  %s4363_s19 = smov 0  }
   0xd   :  { %s4365_s20 = smov 0   ;;  %s4367_s21 = smov 0  }
   0xe   :  { %s4369_s22 = smov 0   ;;  %s4371_s23 = smov 0  }
   0xf   :  { %s4373_s24 = smov 0   ;;  %s4375_s25 = smov 0  }
  0x10 LB: > { %5600 = sst [smem:[#allocation11_spill]] %s4298_s21  ;;  %s31_s26 = sadd.s32 1, %s4306_s23  ;;  %s4314_s25 = sphi %s4375_s25, %s22_s25   ;;  %s4310_s24 = sphi %s4373_s24, %s5684_s24   ;;  %s4306_s23 = sphi %s4371_s23, %s5695_s23   ;;  %s4302_s22 = sphi %s4369_s22, %s5682_s22   ;;  %s4298_s21 = sphi %s4367_s21, %s5694_s21   ;;  %s4294_s20 = sphi %s4365_s20, %s5693_s20   ;;  %s4290_s19 = sphi %s4363_s19, %s5692_s19   ;;  %s4286_s18 = sphi %s4361_s18, %s5691_s18   ;;  %s4282_s17 = sphi %s4359_s17, %s5690_s17   ;;  %s4278_s16 = sphi %s4357_s16, %s5689_s16   ;;  %s4274_s15 = sphi %s4355_s15, %s5688_s15   ;;  %s4270_s14 = sphi %s4353_s14, %s5687_s14   ;;  %s4266_s13 = sphi %s4351_s13, %s5686_s13   ;;  %s4262_s12 = sphi %s4349_s12, %s5685_s12  }
  0x11   : > { %5601 = sst [smem:[#allocation12_spill]] %s4302_s22  ;;  %s34_s27 = sadd.s32 1, %s4310_s24 }
  0x12   : > { %5602 = sst [smem:[#allocation13_spill]] %s4310_s24  ;;  %p32_p0 = scmp.ge.s32.totalorder %s31_s26, 2 }
  0x13   : > { %s43_s28 = sadd.s32 1, %s4294_s20  ;;  %p50_p1 = scmp.ne.s32.totalorder %s4294_s20, %s4290_s19 }
  0x14   : > { %p51_p2 = scmp.eq.s32.totalorder %s4314_s25, 0  ;;  %s5697_s26 = smov (%p32_p0, %s31_s26), 0 }
  0x15   : > { %5603 = sst [smem:[#allocation14_spill]] %s5697_s26  ;;  %s5699_s27 = smov (!%p32_p0, %s34_s27), %s4310_s24 }
  0x16   : > { %s4430_s29 = ssub.s32 %s4306_s23, %s5697_s26  ;;  %p4434_p3 = por %p51_p2, %p50_p1 }
  0x17   : > { %p36_p4 = scmp.ge.s32.totalorder %s5699_s27, 2  ;;  %p56_p5 = scmp.ne.s32.totalorder %s4290_s19, %s4286_s18 }
  0x18   : > { %s121_s4 = sadd.s32 1, %s4270_s14  ;;  %p3703_p6 = scmp.lt.s32.totalorder %s4314_s25, 4 }
  0x19   : > { %s5701_s27 = smov (%p36_p4, %s5699_s27), 0  ;;  %s158_s5 = sand.u32 1, %s4294_s20  }
  0x1a   : > { %5605 = sst [smem:[#allocation15_spill]] %s5701_s27  ;;  %s38_s6 = ssub.s32 %s4310_s24, %s5701_s27 }
  0x1b   : > { %s40_s7 = sor.u32 %s4430_s29, %s38_s6  ;;  %p119_p7 = scmp.eq.s32.totalorder %s38_s6, 0 }
  0x1c   : > { %p41_p8 = scmp.eq.s32.totalorder %s40_s7, 0  ;;  %s3680_s8 = smul.u32 864, %s158_s5 }
  0x1d   : > { %s4449_s9 = scalar_select %p119_p7, %s4270_s14, %s121_s4  }
  0x1e   : > { %s4452_s10 = scalar_select %p41_p8, %s4294_s20, %s43_s28  }
  0x1f   : > { %s164_s11 = smul.u32 9, %s4306_s23  ;;  %s162_s26 = scalar_lea.vmem [#allocation2], %s3680_s8 }
  0x20   : > { %s172_s3 = sshll.u32 %s162_s26, 4  ;;  %s3704_s21 = smul.u32 432, %s4310_s24  ;;  %s173_s3 = int_to_ptr.vmem [resolvable:$true] %s172_s3 }
  0x21   : > { %p4460_p9 = pnand %p3703_p6, %p4434_p3  ;;  %s5607_s0 = sld [smem:[#allocation45_spill]] }
  0x22   : > { %s169_s27 = sadd.s32 %s3704_s21, %s164_s11  ;;  %s159_s28 = scalar_lea.sflag [#allocation3], %s158_s5 }
  0x23   : > { %s3061_s6 = sshll.u32 %s169_s27, 6  ;;  %p4112_p10 = pneg %p4460_p9 }
  0x24   : > { %s4123_s8 = scalar_lea.vmem %s173_s3, 13824  ;;  %s4316_s26 = smov [#allocation2]  }
  0x25   : > { %p4124_p11 = scmp.ne.s32.totalorder %s173_s3, %s4123_s8  ;;  %s4128_s30 = sshll.u32 %s4316_s26, 4  ;;  %s4129_s30 = int_to_ptr.vmem [resolvable:$false] %s4128_s30 }
  0x26   : > { %s4130_s24 = scalar_lea.vmem %s4129_s30, 27648  ;;  %p4131_p0 = scmp.lt.s32.totalorder %s173_s3, %s4129_s30 }
  0x27   : > { %s171_s4 = scalar_lea.hbm %s5607_s0, %s3061_s6  ;;  %p4126_p12 = pnand %p4124_p11, %p4112_p10 }
  0x28   : > { %p4132_p1 = scmp.lt.s32.totalorder %s4130_s24, %s4123_s8 }
  0x29   : > { %p4127_p13 = pneg %p4126_p12 }
  0x2a   : > { %p4133_p3 = por %p4132_p1, %p4131_p0 }
  0x2c   : > { %p4134_p4 = pnand %p4133_p3, %p4127_p13 }
  0x2e   : > { %4137 = shalt.err (!%p4134_p4)
}
  0x2f   : > { %s4317_s21 = smov 1152   ;;  %s4318_s22 = smov 576  }
  0x30   : > { %s4319_s24 = smov 36   ;;  %p3063_p7 = scmp.ge.s32.totalorder %s4314_s25, 1 }
  0x31   : > { %3695 = dma.hbm_to_vmem [thread:$0]  (!%p4460_p9), %s171_s4, 13824, %s173_s3, %s159_s28, %s4317_s21, %s4318_s22, %s4319_s24  }
  0x32   : > { %p210_p8 = scmp.lt.s32.totalorder %s4314_s25, 5  ;;  %s3057_s5 = sadd.s32 4294967295, %s4314_s25  }
  0x33   : > { %s3058_s11 = sadd.s32 4294967294, %s4314_s25   ;;  %p57_p11 = scmp.eq.s32.totalorder %s3057_s5, 0 }
  0x34   : > { %p4473_p10 = pnand %p3063_p7, %p210_p8  ;;  %p67_p12 = scmp.eq.s32.totalorder %s4430_s29, 0 }
  0x35   : > { %s69_s6 = sadd.s32 1, %s4282_s17  ;;  %p4484_p13 = por %p57_p11, %p56_p5 }
  0x36   : > { %p76_p9 = scmp.ne.s32.totalorder %s4282_s17, %s4278_s16  ;;  %p82_p1 = scmp.ne.s32.totalorder %s4278_s16, %s4274_s15 }
  0x37   : > { %s4491_s2 = scalar_select %p67_p12, %s4282_s17, %s69_s6  }
  0x38   : > { %p4495_p0 = por %p76_p9, %p51_p2  ;;  %p131_p3 = scmp.ne.s32.totalorder %s4270_s14, %s4266_s13 }
  0x39   : > { %p132_p4 = scmp.eq.s32.totalorder %s3057_s5, 3  ;;  %p4503_p7 = por %p82_p1, %p57_p11 }
  0x3a   : > { %p137_p5 = scmp.ne.s32.totalorder %s4266_s13, %s4262_s12  ;;  %p138_p12 = scmp.eq.s32.totalorder %s3058_s11, 3 }
  0x3b   : > { %p4509_p8 = por %p132_p4, %p131_p3  ;;  %s182_s4 = sand.u32 1, %s4282_s17  }
  0x3c   : > { %s3250_s28 = smul.u32 9216, %s4306_s23  ;;  %p4515_p2 = por %p138_p12, %p137_p5 }
  0x3d   : > { %s3682_s26 = smul.u32 576, %s182_s4  ;;  %p4526_p11 = pnand %p3703_p6, %p4495_p0 }
  0x3e   : > { %s192_s21 = scalar_lea.hbm %s5576_s1, %s3250_s28  ;;  %s183_s11 = scalar_lea.sflag [#allocation6], %s182_s4 }
  0x3f   : > { %s186_s24 = scalar_lea.vmem [#allocation5], %s3682_s26  ;;  %p4140_p9 = pneg %p4526_p11 }
  0x40   : > { %s193_s5 = sshll.u32 %s186_s24, 4  ;;  %s4320_s0 = smov [#allocation5]   ;;  %s194_s5 = int_to_ptr.vmem [resolvable:$true] %s193_s5 }
  0x41   : > { %s4151_s6 = scalar_lea.vmem %s194_s5, 9216  ;;  %s4156_s15 = sshll.u32 %s4320_s0, 4  ;;  %s4157_s15 = int_to_ptr.vmem [resolvable:$false] %s4156_s15 }
  0x42   : > { %p4152_p1 = scmp.ne.s32.totalorder %s194_s5, %s4151_s6  ;;  %s4158_s3 = scalar_lea.vmem %s4157_s15, 18432 }
  0x43   : > { %p4159_p5 = scmp.lt.s32.totalorder %s194_s5, %s4157_s15  ;;  %p4160_p6 = scmp.lt.s32.totalorder %s4158_s3, %s4151_s6 }
  0x44   : > { %p4154_p3 = pnand %p4152_p1, %p4140_p9 }
  0x45   : > { %p4161_p0 = por %p4160_p6, %p4159_p5 }
  0x46   : > { %p4155_p4 = pneg %p4154_p3 }
  0x48   : > { %p4162_p12 = pnand %p4161_p0, %p4155_p4 }
  0x4a   : > { %4165 = shalt.err (!%p4162_p12)
}
  0x4b   : > { %s4321_s28 = smov 64   ;;  %s4322_s26 = smov 4  }
  0x4c   : > { %3698 = dma.hbm_to_vmem [thread:$0]  (!%p4526_p11), %s192_s21, 9216, %s194_s5, %s183_s11, %s4321_s28, %s4321_s28, %s4322_s26  }
  0x4d   : > { %214 = sbr.rel (%p4473_p10) target bundleno = 1141 (0x475), region = 32 }
  0x52   : > { %s216_s4 = sand.u32 1, %s4290_s19  }
  0x53   : > { %s3683_s30 = smul.u32 864, %s216_s4  ;;  %s217_s0 = scalar_lea.sflag [#allocation3], %s216_s4 }
  0x55   : > { %s4537_s24 = scalar_lea.vmem [#allocation2], %s3683_s30 }
  0x56   : > { %4249 = dma.done.wait (%p4484_p13), %s217_s0, 13824  }
  0x57   : > { %4251 = vsyncadd (%p4484_p13), %s217_s0, 4294953472  ;;  %s225_s6 = sand.u32 1, %s4278_s16  }
  0x58   : > { %s3684_s22 = smul.u32 576, %s225_s6  ;;  %s226_s21 = scalar_lea.sflag [#allocation6], %s225_s6 }
  0x5a   : > { %s4544_s5 = scalar_lea.vmem [#allocation5], %s3684_s22 }
  0x5b   : > { %4253 = dma.done.wait (%p4503_p7), %s226_s21, 9216  }
  0x5c   : > { %4255 = vsyncadd (%p4503_p7), %s226_s21, 4294958080  ;;  %s5615_s27 = sld [smem:[#allocation12_spill]]  ;;  %s259_s11 = sand.u32 1, %s4266_s13  }
  0x5d   : > { %s3685_s7 = smul.u32 192, %s259_s11  ;;  %s5616_s4 = sld [smem:[#allocation46_spill]] }
  0x5e   : > { %s5617_s6 = sld [smem:[#allocation11_spill]] }
  0x5f   : > { %s4559_s0 = scalar_lea.vmem [#allocation7], %s3685_s7 }
  0x62   : > { %s265_s15 = smul.u32 24, %s5615_s27 }
  0x64   : > { %p266_p10 = scmp.lt.s32.totalorder %s265_s15, 47  ;;  %p3065_p13 = scmp.ne.s32.totalorder %s5617_s6, 0 }
  0x66   : > { %s5703_s15 = smov (!%p266_p10, %s265_s15), 47  ;;  %276 = sbr.rel (%p3065_p13) target bundleno = 120 (0x78), region = 44 }
  0x67   : > { %s3064_s3 = sshll.u32 %s5703_s15, 3 }
  0x68   : > { %s4557_s30 = scalar_lea.vmem %s5616_s4, %s3064_s3 }
  0x6b   : > { %v4323_v0 = vmov 0.0  }
  0x6c   : > { %277 = vst [vmem:[%s4559_s0] sm:$0xff] %v4323_v0  ;;  %278 = vst [vmem:[%s4559_s0 + $0x8] sm:$0xff] %v4323_v0 }
  0x6d   : > { %279 = vst [vmem:[%s4559_s0 + $0x10] sm:$0xff] %v4323_v0  ;;  %280 = vst [vmem:[%s4559_s0 + $0x18] sm:$0xff] %v4323_v0 }
  0x6e   : > { %281 = vst [vmem:[%s4559_s0 + $0x20] sm:$0xff] %v4323_v0  ;;  %282 = vst [vmem:[%s4559_s0 + $0x28] sm:$0xff] %v4323_v0 }
  0x6f   : > { %283 = vst [vmem:[%s4559_s0 + $0x30] sm:$0xff] %v4323_v0  ;;  %284 = vst [vmem:[%s4559_s0 + $0x38] sm:$0xff] %v4323_v0 }
  0x70   : > { %285 = vst [vmem:[%s4559_s0 + $0x40] sm:$0xff] %v4323_v0  ;;  %286 = vst [vmem:[%s4559_s0 + $0x48] sm:$0xff] %v4323_v0 }
  0x71   : > { %287 = vst [vmem:[%s4559_s0 + $0x50] sm:$0xff] %v4323_v0  ;;  %288 = vst [vmem:[%s4559_s0 + $0x58] sm:$0xff] %v4323_v0 }
  0x72   : > { %289 = vst [vmem:[%s4559_s0 + $0x60] sm:$0xff] %v4323_v0  ;;  %290 = vst [vmem:[%s4559_s0 + $0x68] sm:$0xff] %v4323_v0 }
  0x73   : > { %291 = vst [vmem:[%s4559_s0 + $0x70] sm:$0xff] %v4323_v0  ;;  %292 = vst [vmem:[%s4559_s0 + $0x78] sm:$0xff] %v4323_v0 }
  0x74   : > { %293 = vst [vmem:[%s4559_s0 + $0x80] sm:$0xff] %v4323_v0  ;;  %294 = vst [vmem:[%s4559_s0 + $0x88] sm:$0xff] %v4323_v0 }
  0x75   : > { %295 = vst [vmem:[%s4559_s0 + $0x90] sm:$0xff] %v4323_v0  ;;  %296 = vst [vmem:[%s4559_s0 + $0x98] sm:$0xff] %v4323_v0 }
  0x76   : > { %297 = vst [vmem:[%s4559_s0 + $0xa0] sm:$0xff] %v4323_v0  ;;  %298 = vst [vmem:[%s4559_s0 + $0xa8] sm:$0xff] %v4323_v0 }
  0x77   : > { %299 = vst [vmem:[%s4559_s0 + $0xb0] sm:$0xff] %v4323_v0  ;;  %300 = vst [vmem:[%s4559_s0 + $0xb8] sm:$0xff] %v4323_v0 }
  0x78 PF: > { %v3828_v1 = vld [vmem:[%s4544_s5 + $0x78] sm:$0xff]   ;;  %v3832_v5 = vld [vmem:[%s4544_s5 + $0x70] sm:$0xff]   ;;  %v3836_v9 = vld [vmem:[%s4544_s5 + $0x68] sm:$0xff]   ;;  %s5648_s29 = sld [smem:[#allocation11_spill]] }
  0x79   : > { %v3829_v2 = vld [vmem:[%s4544_s5 + $0xf8] sm:$0xff]   ;;  %3252 = vmatprep.subr.bf16.mxu0 %v3828_v1  ;;  %v3833_v6 = vld [vmem:[%s4544_s5 + $0xf0] sm:$0xff]   ;;  %v3837_v10 = vld [vmem:[%s4544_s5 + $0xe8] sm:$0xff]  }
  0x7a   : > { %v3830_v3 = vld [vmem:[%s4544_s5 + $0x38] sm:$0xff]   ;;  %3340 = vmatprep.subr.bf16.mxu1 %v3829_v2  ;;  %v3834_v7 = vld [vmem:[%s4544_s5 + $0x30] sm:$0xff]   ;;  %v3838_v11 = vld [vmem:[%s4544_s5 + $0x28] sm:$0xff]  }
  0x7b   : > { %v3831_v4 = vld [vmem:[%s4544_s5 + $0xb8] sm:$0xff]   ;;  %3253 = vmatpush3.bf16.msra.mxu0 %v3830_v3  ;;  %v3835_v8 = vld [vmem:[%s4544_s5 + $0xb0] sm:$0xff]   ;;  %v3839_v12 = vld [vmem:[%s4544_s5 + $0xa8] sm:$0xff]  }
  0x7c   : > { %3341 = vmatpush3.bf16.msra.mxu1 %v3831_v4  ;;  %3254 = vmatprep.subr.bf16.mxu0 %v3832_v5  ;;  %v3840_v13 = vld [vmem:[%s4544_s5 + $0x60] sm:$0xff]   ;;  %v3844_v17 = vld [vmem:[%s4544_s5 + $0x58] sm:$0xff]   ;;  %v3848_v21 = vld [vmem:[%s4544_s5 + $0x50] sm:$0xff]  }
  0x7d   : > { %3342 = vmatprep.subr.bf16.mxu1 %v3833_v6  ;;  %v3841_v14 = vld [vmem:[%s4544_s5 + $0xe0] sm:$0xff]   ;;  %v3845_v18 = vld [vmem:[%s4544_s5 + $0xd8] sm:$0xff]   ;;  %v3849_v22 = vld [vmem:[%s4544_s5 + $0xd0] sm:$0xff]  }
  0x7e   : > { %v3842_v15 = vld [vmem:[%s4544_s5 + $0x20] sm:$0xff]   ;;  %v3846_v19 = vld [vmem:[%s4544_s5 + $0x18] sm:$0xff]   ;;  %v3850_v23 = vld [vmem:[%s4544_s5 + $0x10] sm:$0xff]   ;;  %p3246_p7 = scmp.ne.s32.totalorder %s5648_s29, 1 }
  0x7f   : > { %3255 = vmatpush3.bf16.msra.mxu0 %v3834_v7  ;;  %v3843_v16 = vld [vmem:[%s4544_s5 + $0xa0] sm:$0xff]   ;;  %v3847_v20 = vld [vmem:[%s4544_s5 + $0x98] sm:$0xff]   ;;  %v3851_v24 = vld [vmem:[%s4544_s5 + $0x90] sm:$0xff]  }
  0x80   : > { %3343 = vmatpush3.bf16.msra.mxu1 %v3835_v8  ;;  %3256 = vmatprep.subr.bf16.mxu0 %v3836_v9  ;;  %v3852_v25 = vld [vmem:[%s4544_s5 + $0x48] sm:$0xff]   ;;  %v3856_v29 = vld [vmem:[%s4544_s5 + $0x40] sm:$0xff]   ;;  %v3866_v37 = vld [vmem:[%s4544_s5 + $0x178] sm:$0xff]  }
  0x81   : > { %3344 = vmatprep.subr.bf16.mxu1 %v3837_v10  ;;  %v3853_v26 = vld [vmem:[%s4544_s5 + $0xc8] sm:$0xff]   ;;  %v3857_v30 = vld [vmem:[%s4544_s5 + $0xc0] sm:$0xff]   ;;  %v3867_v38 = vld [vmem:[%s4544_s5 + $0x1f8] sm:$0xff]  }
  0x82   : > { %v3854_v27 = vld [vmem:[%s4544_s5 + $0x8] sm:$0xff]   ;;  %v3858_v31 = vld [vmem:[%s4544_s5] sm:$0xff]   ;;  %v3868_v39 = vld [vmem:[%s4544_s5 + $0x138] sm:$0xff]  }
  0x83   : > { %3257 = vmatpush3.bf16.msra.mxu0 %v3838_v11  ;;  %v3855_v28 = vld [vmem:[%s4544_s5 + $0x88] sm:$0xff]   ;;  %v3859_v32 = vld [vmem:[%s4544_s5 + $0x80] sm:$0xff]   ;;  %v3869_v40 = vld [vmem:[%s4544_s5 + $0x1b8] sm:$0xff]  }
  0x84   : > { %3345 = vmatpush3.bf16.msra.mxu1 %v3839_v12  ;;  %3258 = vmatprep.subr.bf16.mxu0 %v3840_v13  ;;  %v3860_v33 = vld [vmem:[%s4537_s24] ss:$36 sps:$4 sm:$0xff]   ;;  %v3863_v35 = vld [vmem:[%s4537_s24 + $0x8] ss:$36 sps:$4 sm:$0xff]   ;;  %v3872_v42 = vld [vmem:[%s4537_s24 + $0x54] ss:$36 sps:$4 sm:$0xff]  }
  0x85   : > { %3346 = vmatprep.subr.bf16.mxu1 %v3841_v14  ;;  %v3862_v34 = vld [vmem:[%s4537_s24 + $0x4] ss:$36 sps:$4 sm:$0xff]   ;;  %v3865_v36 = vld [vmem:[%s4537_s24 + $0xc] ss:$36 sps:$4 sm:$0xff]   ;;  %v3880_v49 = vld [vmem:[%s4537_s24 + $0x94] ss:$36 sps:$4 sm:$0xff]  }
  0x86   : > { %1605 = vmatprep.mubr.bf16.mxu0 %v3862_v34  ;;  %1734 = vmatprep.mubr.bf16.mxu1 %v3865_v36  ;;  %v3870_v41 = vld [vmem:[%s4537_s24 + $0x4c] ss:$36 sps:$4 sm:$0xff]   ;;  %v3882_v50 = vld [vmem:[%s4537_s24 + $0x9c] ss:$36 sps:$4 sm:$0xff]   ;;  %v3888_v54 = vld [vmem:[%s4537_s24 + $0xe4] ss:$36 sps:$4 sm:$0xff]  }
  0x87   : > { %3259 = vmatpush3.bf16.msra.mxu0 %v3842_v15  ;;  %v3874_v43 = vld [vmem:[%s4537_s24 + $0x48] ss:$36 sps:$4 sm:$0xff]   ;;  %v3875_v44 = vld [vmem:[%s4537_s24 + $0x50] ss:$36 sps:$4 sm:$0xff]   ;;  %v3885_v52 = vld [vmem:[%s4537_s24 + $0x98] ss:$36 sps:$4 sm:$0xff]  }
  0x88   : > { %3347 = vmatpush3.bf16.msra.mxu1 %v3843_v16  ;;  %3260 = vmatprep.subr.bf16.mxu0 %v3844_v17  ;;  %v3876_v45 = vld [vmem:[%s4544_s5 + $0x170] sm:$0xff]   ;;  %v3886_v53 = vld [vmem:[%s4537_s24 + $0xdc] ss:$36 sps:$4 sm:$0xff]   ;;  %v3892_v55 = vld [vmem:[%s4544_s5 + $0x168] sm:$0xff]  }
  0x89   : > { %3348 = vmatprep.subr.bf16.mxu1 %v3845_v18  ;;  %v3877_v46 = vld [vmem:[%s4544_s5 + $0x1f0] sm:$0xff]   ;;  %v3893_v56 = vld [vmem:[%s4544_s5 + $0x1e8] sm:$0xff]   ;;  %v3890_v59 = vld [vmem:[%s4537_s24 + $0xd8] ss:$36 sps:$4 sm:$0xff]  }
  0x8a   : > { %v3878_v47 = vld [vmem:[%s4544_s5 + $0x130] sm:$0xff]   ;;  %v3894_v57 = vld [vmem:[%s4544_s5 + $0x128] sm:$0xff]   ;;  %v3891_v60 = vld [vmem:[%s4537_s24 + $0xe0] ss:$36 sps:$4 sm:$0xff]  }
  0x8b   : > { %3261 = vmatpush3.bf16.msra.mxu0 %v3846_v19  ;;  %v3879_v48 = vld [vmem:[%s4544_s5 + $0x1b0] sm:$0xff]   ;;  %v3895_v58 = vld [vmem:[%s4544_s5 + $0x1a8] sm:$0xff]   ;;  %v3902_v63 = vld [vmem:[%s4544_s5 + $0x160] sm:$0xff]  }
  0x8c   : > { %3349 = vmatpush3.bf16.msra.mxu1 %v3847_v20  ;;  %3262 = vmatprep.subr.bf16.mxu0 %v3848_v21  ;;  %v3884_v51 = vld [vmem:[%s4537_s24 + $0x90] ss:$36 sps:$4 sm:$0xff]   ;;  %v3896_v61 = vld [vmem:[%s4537_s24 + $0x124] ss:$36 sps:$4 sm:$0xff]   ;;  %v3918_v7 = vld [vmem:[%s4544_s5 + $0x158] sm:$0xff]  }
  0x8d   : > { %3350 = vmatprep.subr.bf16.mxu1 %v3849_v22  ;;  %v3898_v62 = vld [vmem:[%s4537_s24 + $0x12c] ss:$36 sps:$4 sm:$0xff]   ;;  %v3903_v0 = vld [vmem:[%s4544_s5 + $0x1e0] sm:$0xff]   ;;  %v3908_v6 = vld [vmem:[%s4537_s24 + $0x174] ss:$36 sps:$4 sm:$0xff]  }
  0x8e   : > { %v3904_v1 = vld [vmem:[%s4544_s5 + $0x120] sm:$0xff]   ;;  %v3901_v4 = vld [vmem:[%s4537_s24 + $0x128] ss:$36 sps:$4 sm:$0xff]   ;;  %v3919_v8 = vld [vmem:[%s4544_s5 + $0x1d8] sm:$0xff]  }
  0x8f   : > { %3263 = vmatpush3.bf16.msra.mxu0 %v3850_v23  ;;  %v3905_v2 = vld [vmem:[%s4544_s5 + $0x1a0] sm:$0xff]   ;;  %v3906_v5 = vld [vmem:[%s4537_s24 + $0x16c] ss:$36 sps:$4 sm:$0xff]   ;;  %v3920_v9 = vld [vmem:[%s4544_s5 + $0x118] sm:$0xff]  }
  0x90   : > { %3351 = vmatpush3.bf16.msra.mxu1 %v3851_v24  ;;  %3264 = vmatprep.subr.bf16.mxu0 %v3852_v25  ;;  %v3900_v3 = vld [vmem:[%s4537_s24 + $0x120] ss:$36 sps:$4 sm:$0xff]   ;;  %v3921_v10 = vld [vmem:[%s4544_s5 + $0x198] sm:$0xff]   ;;  %v3910_v11 = vld [vmem:[%s4537_s24 + $0x168] ss:$36 sps:$4 sm:$0xff]  }
  0x91   : > { %3352 = vmatprep.subr.bf16.mxu1 %v3853_v26  ;;  %v3911_v12 = vld [vmem:[%s4537_s24 + $0x170] ss:$36 sps:$4 sm:$0xff]   ;;  %v3914_v14 = vld [vmem:[%s4537_s24 + $0x1bc] ss:$36 sps:$4 sm:$0xff]   ;;  %v3924_v22 = vld [vmem:[%s4537_s24 + $0x204] ss:$36 sps:$4 sm:$0xff]  }
  0x92   : > { %v3912_v13 = vld [vmem:[%s4537_s24 + $0x1b4] ss:$36 sps:$4 sm:$0xff]   ;;  %v3922_v21 = vld [vmem:[%s4537_s24 + $0x1fc] ss:$36 sps:$4 sm:$0xff]   ;;  %v3944_v23 = vld [vmem:[%s4544_s5 + $0x148] sm:$0xff]  }
  0x93   : > { %3265 = vmatpush3.bf16.msra.mxu0 %v3854_v27  ;;  %v3928_v15 = vld [vmem:[%s4544_s5 + $0x150] sm:$0xff]   ;;  %v3917_v20 = vld [vmem:[%s4537_s24 + $0x1b8] ss:$36 sps:$4 sm:$0xff]   ;;  %v3945_v24 = vld [vmem:[%s4544_s5 + $0x1c8] sm:$0xff]  }
  0x94   : > { %3353 = vmatpush3.bf16.msra.mxu1 %v3855_v28  ;;  %3266 = vmatprep.subr.bf16.mxu0 %v3856_v29  ;;  %v3929_v16 = vld [vmem:[%s4544_s5 + $0x1d0] sm:$0xff]   ;;  %v3946_v25 = vld [vmem:[%s4544_s5 + $0x108] sm:$0xff]   ;;  %v3926_v27 = vld [vmem:[%s4537_s24 + $0x1f8] ss:$36 sps:$4 sm:$0xff]  }
  0x95   : > { %3354 = vmatprep.subr.bf16.mxu1 %v3857_v30  ;;  %v3930_v17 = vld [vmem:[%s4544_s5 + $0x110] sm:$0xff]   ;;  %v3947_v26 = vld [vmem:[%s4544_s5 + $0x188] sm:$0xff]   ;;  %v3927_v28 = vld [vmem:[%s4537_s24 + $0x200] ss:$36 sps:$4 sm:$0xff]  }
  0x96   : > { %v3931_v18 = vld [vmem:[%s4544_s5 + $0x190] sm:$0xff]   ;;  %v3932_v29 = vld [vmem:[%s4537_s24 + $0x244] ss:$36 sps:$4 sm:$0xff]  }
  0x97   : > { %3267 = vmatpush3.bf16.msra.mxu0 %v3858_v31  ;;  %v3916_v19 = vld [vmem:[%s4537_s24 + $0x1b0] ss:$36 sps:$4 sm:$0xff]   ;;  %v3954_v31 = vld [vmem:[%s4544_s5 + $0x140] sm:$0xff]   ;;  %v3937_v36 = vld [vmem:[%s4537_s24 + $0x248] ss:$36 sps:$4 sm:$0xff]  }
  0x98   : > { %3355 = vmatpush3.bf16.msra.mxu1 %v3859_v32  ;;  %3428 = vmatprep.subr.bf16.mxu0 %v3866_v37  ;;  %v3934_v30 = vld [vmem:[%s4537_s24 + $0x24c] ss:$36 sps:$4 sm:$0xff]   ;;  %v3955_v32 = vld [vmem:[%s4544_s5 + $0x1c0] sm:$0xff]  }
  0x99   : > { %3516 = vmatprep.subr.bf16.mxu1 %v3867_v38  ;;  %v3957_v34 = vld [vmem:[%s4544_s5 + $0x180] sm:$0xff]   ;;  %v3938_v37 = vld [vmem:[%s4537_s24 + $0x28c] ss:$36 sps:$4 sm:$0xff]   ;;  %v3940_v38 = vld [vmem:[%s4537_s24 + $0x294] ss:$36 sps:$4 sm:$0xff]  }
  0x9a   : > { %1606 = vmatmul.mubr.bf16.vlgmr.msra.gmra.mxu0 %v3860_v33  ;;  %v3956_v33 = vld [vmem:[%s4544_s5 + $0x100] sm:$0xff]  }
  0x9b   : > { %1735 = vmatmul.mubr.bf16.vlgmr.msra.gmra.mxu1 %v3863_v35  ;;  %3429 = vmatpush3.bf16.msra.mxu0 %v3868_v39  ;;  %v3936_v35 = vld [vmem:[%s4537_s24 + $0x240] ss:$36 sps:$4 sm:$0xff]   ;;  %v3970_v39 = vld [vmem:[%s4544_s5 + $0x238] sm:$0xff]  }
  0x9c   : > { %3517 = vmatpush3.bf16.msra.mxu1 %v3869_v40  ;;  %1613 = vmatprep.mubr.bf16.mxu0 %v3870_v41  ;;  %v3942_v40 = vld [vmem:[%s4537_s24 + $0x288] ss:$36 sps:$4 sm:$0xff]   ;;  %v3943_v41 = vld [vmem:[%s4537_s24 + $0x290] ss:$36 sps:$4 sm:$0xff]  }
  0x9d   : > { %1742 = vmatprep.mubr.bf16.mxu1 %v3872_v42  ;;  %3430 = vmatprep.subr.bf16.mxu0 %v3876_v45  ;;  %v3948_v42 = vld [vmem:[%s4537_s24 + $0x2d4] ss:$36 sps:$4 sm:$0xff]  }
  0x9e   : > { %3518 = vmatprep.subr.bf16.mxu1 %v3877_v46  ;;  %v3953_v45 = vld [vmem:[%s4537_s24 + $0x2d8] ss:$36 sps:$4 sm:$0xff]  }
  0x9f   : > { %3431 = vmatpush3.bf16.msra.mxu0 %v3878_v47  ;;  %v3958_v46 = vld [vmem:[%s4537_s24 + $0x31c] ss:$36 sps:$4 sm:$0xff]   ;;  %v3960_v47 = vld [vmem:[%s4537_s24 + $0x324] ss:$36 sps:$4 sm:$0xff]  }
  0xa0   : > { %3519 = vmatpush3.bf16.msra.mxu1 %v3879_v48  ;;  %3432 = vmatprep.subr.bf16.mxu0 %v3892_v55  ;;  %v3962_v48 = vld [vmem:[%s4537_s24 + $0x318] ss:$36 sps:$4 sm:$0xff]   ;;  %v3973_v55 = vld [vmem:[%s4537_s24 + $0x64] ss:$36 sps:$4 sm:$0xff]  }
  0xa1   : > { %3520 = vmatprep.subr.bf16.mxu1 %v3893_v56  ;;  %v3977_v56 = vld [vmem:[%s4544_s5 + $0x230] sm:$0xff]  }
  0xa2   : > { %1614 = vmatmul.mubr.bf16.gmra.mxu0 %v3874_v43  ;;  %v3950_v43 = vld [vmem:[%s4537_s24 + $0x2dc] ss:$36 sps:$4 sm:$0xff]  }
  0xa3   : > { %1743 = vmatmul.mubr.bf16.gmra.mxu1 %v3875_v44  ;;  %1621 = vmatprep.mubr.bf16.mxu0 %v3880_v49  ;;  %v3952_v44 = vld [vmem:[%s4537_s24 + $0x2d0] ss:$36 sps:$4 sm:$0xff]   ;;  %v3963_v49 = vld [vmem:[%s4537_s24 + $0x320] ss:$36 sps:$4 sm:$0xff]  }
  0xa4   : > { %1750 = vmatprep.mubr.bf16.mxu1 %v3882_v50  ;;  %3433 = vmatpush3.bf16.msra.mxu0 %v3894_v57  ;;  %v3966_v50 = vld [vmem:[%s4537_s24 + $0x14] ss:$36 sps:$4 sm:$0xff]   ;;  %v3990_v57 = vld [vmem:[%s4544_s5 + $0x228] sm:$0xff]  }
  0xa5   : > { %3521 = vmatpush3.bf16.msra.mxu1 %v3895_v58  ;;  %3434 = vmatprep.subr.bf16.mxu0 %v3902_v63  ;;  %v3975_v58 = vld [vmem:[%s4537_s24 + $0x58] ss:$36 sps:$4 sm:$0xff]   ;;  %v3982_v63 = vld [vmem:[%s4537_s24 + $0xa0] ss:$36 sps:$4 sm:$0xff]  }
  0xa6   : > { %3522 = vmatprep.subr.bf16.mxu1 %v3903_v0  ;;  %v4010_v0 = vld [vmem:[%s4544_s5 + $0x218] sm:$0xff]  }
  0xa8   : > { %3435 = vmatpush3.bf16.msra.mxu0 %v3904_v1  ;;  %v3983_v1 = vld [vmem:[%s4537_s24 + $0xa8] ss:$36 sps:$4 sm:$0xff]  }
  0xa9   : > { %3523 = vmatpush3.bf16.msra.mxu1 %v3905_v2  ;;  %3436 = vmatprep.subr.bf16.mxu0 %v3918_v7  ;;  %v3984_v2 = vld [vmem:[%s4537_s24 + $0xec] ss:$36 sps:$4 sm:$0xff]  }
  0xaa   : > { %1622 = vmatmul.mubr.bf16.gmra.mxu0 %v3884_v51  ;;  %3524 = vmatprep.subr.bf16.mxu1 %v3919_v8  ;;  %v3969_v51 = vld [vmem:[%s4537_s24 + $0x1c] ss:$36 sps:$4 sm:$0xff]   ;;  %v3989_v7 = vld [vmem:[%s4537_s24 + $0xf0] ss:$36 sps:$4 sm:$0xff]  }
  0xab   : > { %1751 = vmatmul.mubr.bf16.gmra.mxu1 %v3885_v52  ;;  %1629 = vmatprep.mubr.bf16.mxu0 %v3886_v53  ;;  %v3964_v52 = vld [vmem:[%s4537_s24 + $0x10] ss:$36 sps:$4 sm:$0xff]   ;;  %v3967_v53 = vld [vmem:[%s4537_s24 + $0x18] ss:$36 sps:$4 sm:$0xff]  }
  0xac   : > { %1758 = vmatprep.mubr.bf16.mxu1 %v3888_v54  ;;  %3437 = vmatpush3.bf16.msra.mxu0 %v3920_v9  ;;  %v3971_v54 = vld [vmem:[%s4537_s24 + $0x5c] ss:$36 sps:$4 sm:$0xff]   ;;  %v3991_v8 = vld [vmem:[%s4537_s24 + $0x134] ss:$36 sps:$4 sm:$0xff]  }
  0xad   : > { %3525 = vmatpush3.bf16.msra.mxu1 %v3921_v10  ;;  %3438 = vmatprep.subr.bf16.mxu0 %v3928_v15  ;;  %v3993_v9 = vld [vmem:[%s4537_s24 + $0x13c] ss:$36 sps:$4 sm:$0xff]  }
  0xae   : > { %3526 = vmatprep.subr.bf16.mxu1 %v3929_v16  ;;  %v4037_v10 = vld [vmem:[%s4544_s5 + $0x200] sm:$0xff]   ;;  %v4002_v15 = vld [vmem:[%s4537_s24 + $0x178] ss:$36 sps:$4 sm:$0xff]  }
  0xaf   : > { %v4003_v16 = vld [vmem:[%s4537_s24 + $0x180] ss:$36 sps:$4 sm:$0xff]  }
  0xb0   : > { %3439 = vmatpush3.bf16.msra.mxu0 %v3930_v17  ;;  %v4004_v17 = vld [vmem:[%s4537_s24 + $0x1c4] ss:$36 sps:$4 sm:$0xff]  }
  0xb1   : > { %3527 = vmatpush3.bf16.msra.mxu1 %v3931_v18  ;;  %3440 = vmatprep.subr.bf16.mxu0 %v3944_v23  ;;  %v4006_v18 = vld [vmem:[%s4537_s24 + $0x1cc] ss:$36 sps:$4 sm:$0xff]  }
  0xb2   : > { %1630 = vmatmul.mubr.bf16.gmra.mxu0 %v3890_v59  ;;  %3528 = vmatprep.subr.bf16.mxu1 %v3945_v24  ;;  %v3976_v59 = vld [vmem:[%s4537_s24 + $0x60] ss:$36 sps:$4 sm:$0xff]   ;;  %v4015_v23 = vld [vmem:[%s4537_s24 + $0x208] ss:$36 sps:$4 sm:$0xff]   ;;  %v4016_v24 = vld [vmem:[%s4537_s24 + $0x210] ss:$36 sps:$4 sm:$0xff]  }
  0xb3   : > { %1759 = vmatmul.mubr.bf16.gmra.mxu1 %v3891_v60  ;;  %1637 = vmatprep.mubr.bf16.mxu0 %v3896_v61  ;;  %v3978_v60 = vld [vmem:[%s4537_s24 + $0xa4] ss:$36 sps:$4 sm:$0xff]   ;;  %v3980_v61 = vld [vmem:[%s4537_s24 + $0xac] ss:$36 sps:$4 sm:$0xff]  }
  0xb4   : > { %1766 = vmatprep.mubr.bf16.mxu1 %v3898_v62  ;;  %3441 = vmatpush3.bf16.msra.mxu0 %v3946_v25  ;;  %v3997_v62 = vld [vmem:[%s4544_s5 + $0x220] sm:$0xff]   ;;  %v4018_v25 = vld [vmem:[%s4537_s24 + $0x254] ss:$36 sps:$4 sm:$0xff]  }
  0xb5   : > { %3529 = vmatpush3.bf16.msra.mxu1 %v3947_v26  ;;  %3442 = vmatprep.subr.bf16.mxu0 %v3954_v31  ;;  %v4020_v26 = vld [vmem:[%s4537_s24 + $0x25c] ss:$36 sps:$4 sm:$0xff]  }
  0xb6   : > { %3530 = vmatprep.subr.bf16.mxu1 %v3955_v32  ;;  %v4028_v31 = vld [vmem:[%s4537_s24 + $0x298] ss:$36 sps:$4 sm:$0xff]   ;;  %v4029_v32 = vld [vmem:[%s4537_s24 + $0x2a0] ss:$36 sps:$4 sm:$0xff]  }
  0xb8   : > { %3443 = vmatpush3.bf16.msra.mxu0 %v3956_v33  ;;  %v4031_v33 = vld [vmem:[%s4537_s24 + $0x2e4] ss:$36 sps:$4 sm:$0xff]  }
  0xb9   : > { %3531 = vmatpush3.bf16.msra.mxu1 %v3957_v34  ;;  %3624 = vmatprep.subr.bf16.mxu0 %v3970_v39  ;;  %v4033_v34 = vld [vmem:[%s4537_s24 + $0x2ec] ss:$36 sps:$4 sm:$0xff]  }
  0xba   : > { %1638 = vmatmul.mubr.bf16.gmra.mxu0 %v3900_v3  ;;  %3664 = vmatprep.subr.bf16.mxu1 %v3970_v39  ;;  %v3986_v3 = vld [vmem:[%s4537_s24 + $0xf4] ss:$36 sps:$4 sm:$0xff]  }
  0xbb   : > { %1767 = vmatmul.mubr.bf16.gmra.mxu1 %v3901_v4  ;;  %1645 = vmatprep.mubr.bf16.mxu0 %v3906_v5  ;;  %v4017_v4 = vld [vmem:[%s4544_s5 + $0x210] sm:$0xff]   ;;  %v4030_v5 = vld [vmem:[%s4544_s5 + $0x208] sm:$0xff]  }
  0xbc   : > { %1774 = vmatprep.mubr.bf16.mxu1 %v3908_v6  ;;  %v3988_v6 = vld [vmem:[%s4537_s24 + $0xe8] ss:$36 sps:$4 sm:$0xff]  }
  0xc2   : > { %1646 = vmatmul.mubr.bf16.gmra.mxu0 %v3910_v11  ;;  %v3995_v11 = vld [vmem:[%s4537_s24 + $0x130] ss:$36 sps:$4 sm:$0xff]  }
  0xc3   : > { %1775 = vmatmul.mubr.bf16.gmra.mxu1 %v3911_v12  ;;  %1653 = vmatprep.mubr.bf16.mxu0 %v3912_v13  ;;  %v3996_v12 = vld [vmem:[%s4537_s24 + $0x138] ss:$36 sps:$4 sm:$0xff]  }
  0xc4   : > { %1782 = vmatprep.mubr.bf16.mxu1 %v3914_v14  ;;  %v3998_v13 = vld [vmem:[%s4537_s24 + $0x17c] ss:$36 sps:$4 sm:$0xff]   ;;  %v4000_v14 = vld [vmem:[%s4537_s24 + $0x184] ss:$36 sps:$4 sm:$0xff]  }
  0xca   : > { %1654 = vmatmul.mubr.bf16.gmra.mxu0 %v3916_v19  ;;  %v4008_v19 = vld [vmem:[%s4537_s24 + $0x1c0] ss:$36 sps:$4 sm:$0xff]  }
  0xcb   : > { %1783 = vmatmul.mubr.bf16.gmra.mxu1 %v3917_v20  ;;  %1661 = vmatprep.mubr.bf16.mxu0 %v3922_v21  ;;  %v4009_v20 = vld [vmem:[%s4537_s24 + $0x1c8] ss:$36 sps:$4 sm:$0xff]  }
  0xcc   : > { %1790 = vmatprep.mubr.bf16.mxu1 %v3924_v22  ;;  %v4011_v21 = vld [vmem:[%s4537_s24 + $0x20c] ss:$36 sps:$4 sm:$0xff]   ;;  %v4013_v22 = vld [vmem:[%s4537_s24 + $0x214] ss:$36 sps:$4 sm:$0xff]  }
  0xd2   : > { %1662 = vmatmul.mubr.bf16.gmra.mxu0 %v3926_v27  ;;  %v4022_v27 = vld [vmem:[%s4537_s24 + $0x250] ss:$36 sps:$4 sm:$0xff]  }
  0xd3   : > { %1791 = vmatmul.mubr.bf16.gmra.mxu1 %v3927_v28  ;;  %1669 = vmatprep.mubr.bf16.mxu0 %v3932_v29  ;;  %v4023_v28 = vld [vmem:[%s4537_s24 + $0x258] ss:$36 sps:$4 sm:$0xff]  }
  0xd4   : > { %1798 = vmatprep.mubr.bf16.mxu1 %v3934_v30  ;;  %v4024_v29 = vld [vmem:[%s4537_s24 + $0x29c] ss:$36 sps:$4 sm:$0xff]   ;;  %v4026_v30 = vld [vmem:[%s4537_s24 + $0x2a4] ss:$36 sps:$4 sm:$0xff]  }
  0xda   : > { %1670 = vmatmul.mubr.bf16.gmra.mxu0 %v3936_v35  ;;  %v4035_v35 = vld [vmem:[%s4537_s24 + $0x2e0] ss:$36 sps:$4 sm:$0xff]  }
  0xdb   : > { %1799 = vmatmul.mubr.bf16.gmra.mxu1 %v3937_v36  ;;  %1677 = vmatprep.mubr.bf16.mxu0 %v3938_v37  ;;  %v4036_v36 = vld [vmem:[%s4537_s24 + $0x2e8] ss:$36 sps:$4 sm:$0xff]  }
  0xdc   : > { %1806 = vmatprep.mubr.bf16.mxu1 %v3940_v38  ;;  %v4038_v37 = vld [vmem:[%s4537_s24 + $0x32c] ss:$36 sps:$4 sm:$0xff]   ;;  %v4040_v38 = vld [vmem:[%s4537_s24 + $0x334] ss:$36 sps:$4 sm:$0xff]  }
  0xe2   : > { %1678 = vmatmul.mubr.bf16.gmra.mxu0 %v3942_v40  ;;  %v4043_v40 = vld [vmem:[%s4537_s24 + $0x330] ss:$36 sps:$4 sm:$0xff]  }
  0xe3   : > { %1807 = vmatmul.mubr.bf16.gmra.mxu1 %v3943_v41  ;;  %1685 = vmatprep.mubr.bf16.mxu0 %v3948_v42  ;;  %v4044_v41 = vld [vmem:[%s4537_s24 + $0x20] ss:$36 sps:$4 sm:$0xff]   ;;  %v4045_v42 = vld [vmem:[%s4537_s24 + $0x1d0] ss:$36 sps:$4 sm:$0xff]  }
  0xe4   : > { %1814 = vmatprep.mubr.bf16.mxu1 %v3950_v43  ;;  %v4046_v43 = vld [vmem:[%s4537_s24 + $0x68] ss:$36 sps:$4 sm:$0xff]  }
  0xea   : > { %1686 = vmatmul.mubr.bf16.gmra.mxu0 %v3952_v44  ;;  %v4047_v44 = vld [vmem:[%s4537_s24 + $0x218] ss:$36 sps:$4 sm:$0xff]  }
  0xeb   : > { %1815 = vmatmul.mubr.bf16.gmra.mxu1 %v3953_v45  ;;  %1693 = vmatprep.mubr.bf16.mxu0 %v3958_v46  ;;  %v4048_v45 = vld [vmem:[%s4537_s24 + $0xb0] ss:$36 sps:$4 sm:$0xff]   ;;  %v4049_v46 = vld [vmem:[%s4537_s24 + $0x260] ss:$36 sps:$4 sm:$0xff]  }
  0xec   : > { %1822 = vmatprep.mubr.bf16.mxu1 %v3960_v47 }
  0xf2   : > { %1694 = vmatmul.mubr.bf16.gmra.mxu0 %v3962_v48 }
  0xf3   : > { %1823 = vmatmul.mubr.bf16.gmra.mxu1 %v3963_v49  ;;  %1863 = vmatprep.mubr.bf16.mxu0 %v3966_v50 }
  0xf4   : > { %1992 = vmatprep.mubr.bf16.mxu1 %v3969_v51 }
  0xfa   : > { %1864 = vmatmul.mubr.bf16.vlgmr.msra.gmra.mxu0 %v3964_v52 }
  0xfb   : > { %1993 = vmatmul.mubr.bf16.vlgmr.msra.gmra.mxu1 %v3967_v53  ;;  %3625 = vmatpush3.bf16.msra.mxu0 %v3970_v39 }
  0xfc   : > { %3672 = vmatpush3.bf16.msra.mxu1 %v3970_v39  ;;  %1871 = vmatprep.mubr.bf16.mxu0 %v3971_v54  ;;  %v4042_v39 = vld [vmem:[%s4537_s24 + $0x328] ss:$36 sps:$4 sm:$0xff]   ;;  %v4050_v54 = vld [vmem:[%s4537_s24 + $0xf8] ss:$36 sps:$4 sm:$0xff]  }
  0xfd   : > { %2000 = vmatprep.mubr.bf16.mxu1 %v3973_v55  ;;  %3626 = vmatprep.subr.bf16.mxu0 %v3977_v56 }
  0xfe   : > { %3665 = vmatprep.subr.bf16.mxu1 %v3977_v56 }
  0xff   : > { %3627 = vmatpush3.bf16.msra.mxu0 %v3977_v56 }
 0x100   : > { %3673 = vmatpush3.bf16.msra.mxu1 %v3977_v56  ;;  %3628 = vmatprep.subr.bf16.mxu0 %v3990_v57  ;;  %v4051_v56 = vld [vmem:[%s4537_s24 + $0x2a8] ss:$36 sps:$4 sm:$0xff]  }
 0x101   : > { %3666 = vmatprep.subr.bf16.mxu1 %v3990_v57 }
 0x102   : > { %1872 = vmatmul.mubr.bf16.gmra.mxu0 %v3975_v58 }
 0x103   : > { %2001 = vmatmul.mubr.bf16.gmra.mxu1 %v3976_v59  ;;  %1879 = vmatprep.mubr.bf16.mxu0 %v3978_v60  ;;  %v4053_v60 = vld [vmem:[%s4537_s24 + $0x2f0] ss:$36 sps:$4 sm:$0xff]  }
 0x104   : > { %2008 = vmatprep.mubr.bf16.mxu1 %v3980_v61  ;;  %3629 = vmatpush3.bf16.msra.mxu0 %v3990_v57 }
 0x105   : > { %3674 = vmatpush3.bf16.msra.mxu1 %v3990_v57  ;;  %3630 = vmatprep.subr.bf16.mxu0 %v3997_v62  ;;  %v4052_v57 = vld [vmem:[%s4537_s24 + $0x140] ss:$36 sps:$4 sm:$0xff]  }
 0x106   : > { %3667 = vmatprep.subr.bf16.mxu1 %v3997_v62 }
 0x108   : > { %3631 = vmatpush3.bf16.msra.mxu0 %v3997_v62 }
 0x109   : > { %3675 = vmatpush3.bf16.msra.mxu1 %v3997_v62  ;;  %3632 = vmatprep.subr.bf16.mxu0 %v4010_v0 }
 0x10a   : > { %1880 = vmatmul.mubr.bf16.gmra.mxu0 %v3982_v63  ;;  %3668 = vmatprep.subr.bf16.mxu1 %v4010_v0 }
 0x10b   : > { %2009 = vmatmul.mubr.bf16.gmra.mxu1 %v3983_v1  ;;  %1887 = vmatprep.mubr.bf16.mxu0 %v3984_v2 }
 0x10c   : > { %2016 = vmatprep.mubr.bf16.mxu1 %v3986_v3  ;;  %3633 = vmatpush3.bf16.msra.mxu0 %v4010_v0 }
 0x10d   : > { %3676 = vmatpush3.bf16.msra.mxu1 %v4010_v0  ;;  %3634 = vmatprep.subr.bf16.mxu0 %v4017_v4 }
 0x10e   : > { %3669 = vmatprep.subr.bf16.mxu1 %v4017_v4 }
 0x110   : > { %3635 = vmatpush3.bf16.msra.mxu0 %v4017_v4 }
 0x111   : > { %3677 = vmatpush3.bf16.msra.mxu1 %v4017_v4  ;;  %3636 = vmatprep.subr.bf16.mxu0 %v4030_v5 }
 0x112   : > { %1888 = vmatmul.mubr.bf16.gmra.mxu0 %v3988_v6  ;;  %3670 = vmatprep.subr.bf16.mxu1 %v4030_v5 }
 0x113   : > { %2017 = vmatmul.mubr.bf16.gmra.mxu1 %v3989_v7  ;;  %1895 = vmatprep.mubr.bf16.mxu0 %v3991_v8  ;;  %v4054_v8 = vld [vmem:[%s4537_s24 + $0x188] ss:$36 sps:$4 sm:$0xff]  }
 0x114   : > { %2024 = vmatprep.mubr.bf16.mxu1 %v3993_v9  ;;  %3637 = vmatpush3.bf16.msra.mxu0 %v4030_v5 }
 0x115   : > { %3678 = vmatpush3.bf16.msra.mxu1 %v4030_v5  ;;  %3638 = vmatprep.subr.bf16.mxu0 %v4037_v10 }
 0x116   : > { %3671 = vmatprep.subr.bf16.mxu1 %v4037_v10 }
 0x118   : > { %3639 = vmatpush3.bf16.msra.mxu0 %v4037_v10 }
 0x119   : > { %3679 = vmatpush3.bf16.msra.mxu1 %v4037_v10  ;;  %v4055_v10 = vld [vmem:[%s4537_s24 + $0x338] ss:$36 sps:$4 sm:$0xff]  }
 0x11a   : > { %1896 = vmatmul.mubr.bf16.gmra.mxu0 %v3995_v11 }
 0x11b   : > { %2025 = vmatmul.mubr.bf16.gmra.mxu1 %v3996_v12  ;;  %1903 = vmatprep.mubr.bf16.mxu0 %v3998_v13 }
 0x11c   : > { %2032 = vmatprep.mubr.bf16.mxu1 %v4000_v14 }
 0x122   : > { %1904 = vmatmul.mubr.bf16.gmra.mxu0 %v4002_v15 }
 0x123   : > { %2033 = vmatmul.mubr.bf16.gmra.mxu1 %v4003_v16  ;;  %1911 = vmatprep.mubr.bf16.mxu0 %v4004_v17 }
 0x124   : > { %2040 = vmatprep.mubr.bf16.mxu1 %v4006_v18 }
 0x12a   : > { %1912 = vmatmul.mubr.bf16.gmra.mxu0 %v4008_v19 }
 0x12b   : > { %2041 = vmatmul.mubr.bf16.gmra.mxu1 %v4009_v20  ;;  %1919 = vmatprep.mubr.bf16.mxu0 %v4011_v21 }
 0x12c   : > { %2048 = vmatprep.mubr.bf16.mxu1 %v4013_v22 }
 0x132   : > { %1920 = vmatmul.mubr.bf16.gmra.mxu0 %v4015_v23 }
 0x133   : > { %2049 = vmatmul.mubr.bf16.gmra.mxu1 %v4016_v24  ;;  %1927 = vmatprep.mubr.bf16.mxu0 %v4018_v25 }
 0x134   : > { %2056 = vmatprep.mubr.bf16.mxu1 %v4020_v26 }
 0x13a   : > { %1928 = vmatmul.mubr.bf16.gmra.mxu0 %v4022_v27 }
 0x13b   : > { %2057 = vmatmul.mubr.bf16.gmra.mxu1 %v4023_v28  ;;  %1935 = vmatprep.mubr.bf16.mxu0 %v4024_v29 }
 0x13c   : > { %2064 = vmatprep.mubr.bf16.mxu1 %v4026_v30 }
 0x142   : > { %1936 = vmatmul.mubr.bf16.gmra.mxu0 %v4028_v31 }
 0x143   : > { %2065 = vmatmul.mubr.bf16.gmra.mxu1 %v4029_v32  ;;  %1943 = vmatprep.mubr.bf16.mxu0 %v4031_v33 }
 0x144   : > { %2072 = vmatprep.mubr.bf16.mxu1 %v4033_v34 }
 0x14a   : > { %1944 = vmatmul.mubr.bf16.gmra.mxu0 %v4035_v35 }
 0x14b   : > { %2073 = vmatmul.mubr.bf16.gmra.mxu1 %v4036_v36  ;;  %1951 = vmatprep.mubr.bf16.mxu0 %v4038_v37 }
 0x14c   : > { %2080 = vmatprep.mubr.bf16.mxu1 %v4040_v38 }
 0x152   : > { %1952 = vmatmul.mubr.bf16.gmra.mxu0 %v4042_v39 }
 0x153   : > { %2081 = vmatmul.mubr.bf16.gmra.mxu1 %v4043_v40  ;;  %3640 = vmatprep.mubr.bf16.mxu0 %v4044_v41 }
 0x154   : > { %3652 = vmatprep.mubr.bf16.mxu1 %v4045_v42 }
 0x15a   : > { %v3268_v47 = vpop.f32.mrf.mxu0  ;;  %3641 = vmatmul.mubr.bf16.vlgmr.msra.gmra.mxu0 %v4046_v43 }
 0x15b   : > { %v3356_v48 = vpop.f32.mrf.mxu1  ;;  %3653 = vmatmul.mubr.bf16.vlgmr.msra.gmra.mxu1 %v4047_v44  ;;  %3644 = vmatprep.mubr.bf16.mxu0 %v4048_v45 }
 0x15c   : > { %v3269_v49 = vpop.f32.mrf.mxu0  ;;  %3656 = vmatprep.mubr.bf16.mxu1 %v4049_v46 }
 0x15d   : > { %v3270_v50 = vadd.f32 %v3269_v49, %v3268_v47  ;;  %v3357_v51 = vpop.f32.mrf.mxu1 }
 0x15e   : > { %v3358_v52 = vadd.f32 %v3357_v51, %v3356_v48  ;;  %v3271_v53 = vpop.f32.mrf.mxu0 }
 0x15f   : > { %v3359_v55 = vpop.f32.mrf.mxu1 }
 0x160   : > { %v4763_v58 = vadd.f32 %v3358_v52, %v3270_v50  ;;  %v3272_v59 = vpop.f32.mrf.mxu0 }
 0x161   : > { %v3273_v61 = vadd.f32 %v3272_v59, %v3271_v53  ;;  %v3360_v62 = vpop.f32.mrf.mxu1 }
 0x162   : > { %v3361_v63 = vadd.f32 %v3360_v62, %v3359_v55  ;;  %v3274_v0 = vpop.f32.mrf.mxu0  ;;  %3645 = vmatmul.mubr.bf16.gmra.mxu0 %v4050_v54 }
 0x163   : > { %v3362_v1 = vpop.f32.mrf.mxu1  ;;  %3657 = vmatmul.mubr.bf16.gmra.mxu1 %v4051_v56  ;;  %3648 = vmatprep.mubr.bf16.mxu0 %v4052_v57 }
 0x164   : > { %v4766_v2 = vadd.f32 %v3361_v63, %v3273_v61  ;;  %v3275_v3 = vpop.f32.mrf.mxu0  ;;  %3660 = vmatprep.mubr.bf16.mxu1 %v4053_v60 }
 0x165   : > { %v3276_v4 = vadd.f32 %v3275_v3, %v3274_v0  ;;  %v3363_v5 = vpop.f32.mrf.mxu1 }
 0x166   : > { %v3364_v6 = vadd.f32 %v3363_v5, %v3362_v1  ;;  %v3277_v7 = vpop.f32.mrf.mxu0 }
 0x167   : > { %v3365_v9 = vpop.f32.mrf.mxu1 }
 0x168   : > { %v4770_v11 = vadd.f32 %v3364_v6, %v3276_v4  ;;  %v3278_v12 = vpop.f32.mrf.mxu0 }
 0x169   : > { %v3279_v13 = vadd.f32 %v3278_v12, %v3277_v7  ;;  %v3366_v14 = vpop.f32.mrf.mxu1 }
 0x16a   : > { %v3367_v15 = vadd.f32 %v3366_v14, %v3365_v9  ;;  %v3280_v16 = vpop.f32.mrf.mxu0  ;;  %3649 = vmatmul.mubr.bf16.gmra.mxu0 %v4054_v8 }
 0x16b   : > { %v3368_v17 = vpop.f32.mrf.mxu1  ;;  %3661 = vmatmul.mubr.bf16.gmra.mxu1 %v4055_v10 }
 0x16c   : > { %v4772_v18 = vadd.f32 %v3367_v15, %v3279_v13  ;;  %v3281_v19 = vpop.f32.mrf.mxu0 }
 0x16d   : > { %v3282_v20 = vadd.f32 %v3281_v19, %v3280_v16  ;;  %v3369_v21 = vpop.f32.mrf.mxu1 }
 0x16e   : > { %v3370_v22 = vadd.f32 %v3369_v21, %v3368_v17  ;;  %v3283_v23 = vpop.f32.mrf.mxu0 }
 0x16f   : > { %v3371_v24 = vpop.f32.mrf.mxu1 }
 0x170   : > { %v4774_v25 = vadd.f32 %v3370_v22, %v3282_v20  ;;  %v3284_v26 = vpop.f32.mrf.mxu0 }
 0x171   : > { %v3285_v27 = vadd.f32 %v3284_v26, %v3283_v23  ;;  %v3372_v28 = vpop.f32.mrf.mxu1 }
 0x172   : > { %v3373_v29 = vadd.f32 %v3372_v28, %v3371_v24  ;;  %v3286_v30 = vpop.f32.mrf.mxu0 }
 0x173   : > { %v3374_v31 = vpop.f32.mrf.mxu1 }
 0x174   : > { %v4776_v32 = vadd.f32 %v3373_v29, %v3285_v27  ;;  %v3287_v33 = vpop.f32.mrf.mxu0 }
 0x175   : > { %v3288_v34 = vadd.f32 %v3287_v33, %v3286_v30  ;;  %v3375_v35 = vpop.f32.mrf.mxu1 }
 0x176   : > { %v3376_v36 = vadd.f32 %v3375_v35, %v3374_v31  ;;  %v3289_v37 = vpop.f32.mrf.mxu0 }
 0x177   : > { %v3377_v38 = vpop.f32.mrf.mxu1 }
 0x178   : > { %v4778_v39 = vadd.f32 %v3376_v36, %v3288_v34  ;;  %v3290_v40 = vpop.f32.mrf.mxu0 }
 0x179   : > { %v3291_v41 = vadd.f32 %v3290_v40, %v3289_v37  ;;  %v3378_v42 = vpop.f32.mrf.mxu1 }
 0x17a   : > { %v3379_v43 = vadd.f32 %v3378_v42, %v3377_v38  ;;  %v3292_v44 = vpop.f32.mrf.mxu0 }
 0x17b   : > { %v3380_v45 = vpop.f32.mrf.mxu1 }
 0x17c   : > { %v4780_v46 = vadd.f32 %v3379_v43, %v3291_v41  ;;  %v3293_v47 = vpop.f32.mrf.mxu0 }
 0x17d   : > { %v3294_v48 = vadd.f32 %v3293_v47, %v3292_v44  ;;  %v3381_v49 = vpop.f32.mrf.mxu1 }
 0x17e   : > { %v3382_v50 = vadd.f32 %v3381_v49, %v3380_v45  ;;  %v3295_v51 = vpop.f32.mrf.mxu0 }
 0x17f   : > { %v3383_v52 = vpop.f32.mrf.mxu1 }
 0x180   : > { %v4782_v53 = vadd.f32 %v3382_v50, %v3294_v48  ;;  %v3296_v54 = vpop.f32.mrf.mxu0 }
 0x181   : > { %v3297_v55 = vadd.f32 %v3296_v54, %v3295_v51  ;;  %v3384_v56 = vpop.f32.mrf.mxu1 }
 0x182   : > { %v3385_v57 = vadd.f32 %v3384_v56, %v3383_v52  ;;  %v3298_v59 = vpop.f32.mrf.mxu0 }
 0x183   : > { %v3386_v60 = vpop.f32.mrf.mxu1 }
 0x184   : > { %v4784_v61 = vadd.f32 %v3385_v57, %v3297_v55  ;;  %v3299_v62 = vpop.f32.mrf.mxu0 }
 0x185   : > { %v3300_v63 = vadd.f32 %v3299_v62, %v3298_v59  ;;  %v3387_v0 = vpop.f32.mrf.mxu1 }
 0x186   : > { %v3388_v1 = vadd.f32 %v3387_v0, %v3386_v60  ;;  %v3301_v3 = vpop.f32.mrf.mxu0 }
 0x187   : > { %v3389_v4 = vpop.f32.mrf.mxu1 }
 0x188   : > { %v4786_v5 = vadd.f32 %v3388_v1, %v3300_v63  ;;  %v3302_v6 = vpop.f32.mrf.mxu0 }
 0x189   : > { %v3303_v7 = vadd.f32 %v3302_v6, %v3301_v3  ;;  %v3390_v8 = vpop.f32.mrf.mxu1 }
 0x18a   : > { %v3391_v9 = vadd.f32 %v3390_v8, %v3389_v4  ;;  %v3304_v10 = vpop.f32.mrf.mxu0 }
 0x18b   : > { %v3392_v12 = vpop.f32.mrf.mxu1 }
 0x18c   : > { %v4788_v13 = vadd.f32 %v3391_v9, %v3303_v7  ;;  %v3305_v14 = vpop.f32.mrf.mxu0 }
 0x18d   : > { %v3306_v15 = vadd.f32 %v3305_v14, %v3304_v10  ;;  %v3393_v16 = vpop.f32.mrf.mxu1 }
 0x18e   : > { %v3394_v17 = vadd.f32 %v3393_v16, %v3392_v12  ;;  %v3307_v19 = vpop.f32.mrf.mxu0 }
 0x18f   : > { %v3395_v20 = vpop.f32.mrf.mxu1 }
 0x190   : > { %v4790_v21 = vadd.f32 %v3394_v17, %v3306_v15  ;;  %v3308_v22 = vpop.f32.mrf.mxu0 }
 0x191   : > { %v3309_v23 = vadd.f32 %v3308_v22, %v3307_v19  ;;  %v3396_v24 = vpop.f32.mrf.mxu1 }
 0x192   : > { %v3397_v26 = vadd.f32 %v3396_v24, %v3395_v20  ;;  %v3310_v27 = vpop.f32.mrf.mxu0 }
 0x193   : > { %v3398_v28 = vpop.f32.mrf.mxu1 }
 0x194   : > { %v4792_v29 = vadd.f32 %v3397_v26, %v3309_v23  ;;  %v3311_v30 = vpop.f32.mrf.mxu0 }
 0x195   : > { %v3312_v31 = vadd.f32 %v3311_v30, %v3310_v27  ;;  %v3399_v33 = vpop.f32.mrf.mxu1 }
 0x196   : > { %v3400_v34 = vadd.f32 %v3399_v33, %v3398_v28  ;;  %v3313_v35 = vpop.f32.mrf.mxu0 }
 0x197   : > { %v3401_v36 = vpop.f32.mrf.mxu1 }
 0x198   : > { %v4794_v37 = vadd.f32 %v3400_v34, %v3312_v31  ;;  %v3314_v38 = vpop.f32.mrf.mxu0 }
 0x199   : > { %v3315_v40 = vadd.f32 %v3314_v38, %v3313_v35  ;;  %v3402_v41 = vpop.f32.mrf.mxu1 }
 0x19a   : > { %v3403_v42 = vadd.f32 %v3402_v41, %v3401_v36  ;;  %v3316_v43 = vpop.f32.mrf.mxu0 }
 0x19b   : > { %v3404_v44 = vpop.f32.mrf.mxu1 }
 0x19c   : > { %v4796_v45 = vadd.f32 %v3403_v42, %v3315_v40  ;;  %v3317_v47 = vpop.f32.mrf.mxu0 }
 0x19d   : > { %v3318_v48 = vadd.f32 %v3317_v47, %v3316_v43  ;;  %v3405_v49 = vpop.f32.mrf.mxu1 }
 0x19e   : > { %v3406_v50 = vadd.f32 %v3405_v49, %v3404_v44  ;;  %v3319_v51 = vpop.f32.mrf.mxu0 }
 0x19f   : > { %v3407_v52 = vpop.f32.mrf.mxu1 }
 0x1a0   : > { %v4798_v54 = vadd.f32 %v3406_v50, %v3318_v48  ;;  %v3320_v55 = vpop.f32.mrf.mxu0 }
 0x1a1   : > { %v3321_v56 = vadd.f32 %v3320_v55, %v3319_v51  ;;  %v3408_v57 = vpop.f32.mrf.mxu1 }
 0x1a2   : > { %v3409_v59 = vadd.f32 %v3408_v57, %v3407_v52  ;;  %v3322_v60 = vpop.f32.mrf.mxu0 }
 0x1a3   : > { %v3410_v62 = vpop.f32.mrf.mxu1 }
 0x1a4   : > { %v4800_v63 = vadd.f32 %v3409_v59, %v3321_v56  ;;  %v3323_v0 = vpop.f32.mrf.mxu0 }
 0x1a5   : > { %v3324_v1 = vadd.f32 %v3323_v0, %v3322_v60  ;;  %v3411_v3 = vpop.f32.mrf.mxu1 }
 0x1a6   : > { %v3412_v4 = vadd.f32 %v3411_v3, %v3410_v62  ;;  %v3325_v6 = vpop.f32.mrf.mxu0 }
 0x1a7   : > { %v3413_v7 = vpop.f32.mrf.mxu1 }
 0x1a8   : > { %v4802_v8 = vadd.f32 %v3412_v4, %v3324_v1  ;;  %v3326_v9 = vpop.f32.mrf.mxu0 }
 0x1a9   : > { %v3327_v10 = vadd.f32 %v3326_v9, %v3325_v6  ;;  %v3414_v12 = vpop.f32.mrf.mxu1 }
 0x1aa   : > { %v3415_v14 = vadd.f32 %v3414_v12, %v3413_v7  ;;  %v3328_v15 = vpop.f32.mrf.mxu0 }
 0x1ab   : > { %v3416_v16 = vpop.f32.mrf.mxu1 }
 0x1ac   : > { %v4804_v17 = vadd.f32 %v3415_v14, %v3327_v10  ;;  %v3329_v19 = vpop.f32.mrf.mxu0 }
 0x1ad   : > { %v3330_v20 = vadd.f32 %v3329_v19, %v3328_v15  ;;  %v3417_v22 = vpop.f32.mrf.mxu1 }
 0x1ae   : > { %v3418_v23 = vadd.f32 %v3417_v22, %v3416_v16  ;;  %v3331_v24 = vpop.f32.mrf.mxu0 }
 0x1af   : > { %v3419_v26 = vpop.f32.mrf.mxu1 }
 0x1b0   : > { %v4806_v27 = vadd.f32 %v3418_v23, %v3330_v20  ;;  %v3332_v28 = vpop.f32.mrf.mxu0 }
 0x1b1   : > { %v3333_v30 = vadd.f32 %v3332_v28, %v3331_v24  ;;  %v3420_v31 = vpop.f32.mrf.mxu1 }
 0x1b2   : > { %v3421_v33 = vadd.f32 %v3420_v31, %v3419_v26  ;;  %v3334_v34 = vpop.f32.mrf.mxu0 }
 0x1b3   : > { %v3422_v35 = vpop.f32.mrf.mxu1 }
 0x1b4   : > { %v4808_v36 = vadd.f32 %v3421_v33, %v3333_v30  ;;  %v3335_v38 = vpop.f32.mrf.mxu0 }
 0x1b5   : > { %v3336_v40 = vadd.f32 %v3335_v38, %v3334_v34  ;;  %v3423_v41 = vpop.f32.mrf.mxu1 }
 0x1b6   : > { %5618 = vst [vmem:[#allocation16_spill] sm:$0xff] %v4808_v36  ;;  %v3424_v42 = vadd.f32 %v3423_v41, %v3422_v35  ;;  %v3337_v43 = vpop.f32.mrf.mxu0 }
 0x1b7   : > { %v3425_v44 = vpop.f32.mrf.mxu1 }
 0x1b8   : > { %v4810_v47 = vadd.f32 %v3424_v42, %v3336_v40  ;;  %v3338_v48 = vpop.f32.mrf.mxu0 }
 0x1b9   : > { %v3339_v49 = vadd.f32 %v3338_v48, %v3337_v43  ;;  %v3426_v50 = vpop.f32.mrf.mxu1 }
 0x1ba   : > { %v3427_v51 = vadd.f32 %v3426_v50, %v3425_v44  ;;  %v3444_v52 = vpop.f32.mrf.mxu0 }
 0x1bb   : > { %v3532_v55 = vpop.f32.mrf.mxu1 }
 0x1bc   : > { %v4812_v56 = vadd.f32 %v3427_v51, %v3339_v49  ;;  %v3445_v57 = vpop.f32.mrf.mxu0 }
 0x1bd   : > { %v3446_v59 = vadd.f32 %v3445_v57, %v3444_v52  ;;  %v3533_v60 = vpop.f32.mrf.mxu1 }
 0x1be   : > { %5619 = vst [vmem:[#allocation17_spill] sm:$0xff] %v4812_v56  ;;  %v3534_v62 = vadd.f32 %v3533_v60, %v3532_v55  ;;  %v3447_v0 = vpop.f32.mrf.mxu0 }
 0x1bf   : > { %v1866_v1 = vadd.f32 %v3446_v59, %v4763_v58  ;;  %v3535_v3 = vpop.f32.mrf.mxu1 }
 0x1c0   : > { %v3448_v4 = vpop.f32.mrf.mxu0 }
 0x1c1   : > { %v3449_v6 = vadd.f32 %v3448_v4, %v3447_v0  ;;  %v3536_v7 = vpop.f32.mrf.mxu1  ;;  %v4815_v9 = vadd.f32 %v3534_v62, %v1866_v1 }
 0x1c2   : > { %v3537_v10 = vadd.f32 %v3536_v7, %v3535_v3  ;;  %v3450_v12 = vpop.f32.mrf.mxu0 }
 0x1c3   : > { %v1869_v14 = vadd.f32 %v3449_v6, %v4766_v2  ;;  %v3538_v15 = vpop.f32.mrf.mxu1 }
 0x1c4   : > { %v3451_v16 = vpop.f32.mrf.mxu0 }
 0x1c5   : > { %v3452_v19 = vadd.f32 %v3451_v16, %v3450_v12  ;;  %v3539_v20 = vpop.f32.mrf.mxu1  ;;  %v4818_v22 = vadd.f32 %v3537_v10, %v1869_v14 }
 0x1c6   : > { %v3540_v23 = vadd.f32 %v3539_v20, %v3538_v15  ;;  %v3453_v24 = vpop.f32.mrf.mxu0 }
 0x1c7   : > { %v1874_v58 = vadd.f32 %v3452_v19, %v4770_v11  ;;  %v3541_v26 = vpop.f32.mrf.mxu1 }
 0x1c8   : > { %v3454_v28 = vpop.f32.mrf.mxu0 }
 0x1c9   : > { %v3455_v30 = vadd.f32 %v3454_v28, %v3453_v24  ;;  %v3542_v31 = vpop.f32.mrf.mxu1  ;;  %v4821_v33 = vadd.f32 %v3540_v23, %v1874_v58 }
 0x1ca   : > { %v3543_v34 = vadd.f32 %v3542_v31, %v3541_v26  ;;  %v3456_v35 = vpop.f32.mrf.mxu0 }
 0x1cb   : > { %v1877_v2 = vadd.f32 %v3455_v30, %v4772_v18  ;;  %v3544_v38 = vpop.f32.mrf.mxu1 }
 0x1cc   : > { %v3457_v40 = vpop.f32.mrf.mxu0 }
 0x1cd   : > { %v3458_v41 = vadd.f32 %v3457_v40, %v3456_v35  ;;  %v3545_v42 = vpop.f32.mrf.mxu1  ;;  %v4824_v43 = vadd.f32 %v3543_v34, %v1877_v2 }
 0x1ce   : > { %v3546_v44 = vadd.f32 %v3545_v42, %v3544_v38  ;;  %v3459_v48 = vpop.f32.mrf.mxu0 }
 0x1cf   : > { %v1882_v11 = vadd.f32 %v3458_v41, %v4774_v25  ;;  %v3547_v49 = vpop.f32.mrf.mxu1 }
 0x1d0   : > { %v3460_v50 = vpop.f32.mrf.mxu0 }
 0x1d1   : > { %v3461_v51 = vadd.f32 %v3460_v50, %v3459_v48  ;;  %v3548_v52 = vpop.f32.mrf.mxu1  ;;  %v4827_v55 = vadd.f32 %v3546_v44, %v1882_v11 }
 0x1d2   : > { %v3549_v57 = vadd.f32 %v3548_v52, %v3547_v49  ;;  %v3462_v59 = vpop.f32.mrf.mxu0 }
 0x1d3   : > { %v1885_v18 = vadd.f32 %v3461_v51, %v4776_v32  ;;  %v3550_v60 = vpop.f32.mrf.mxu1 }
 0x1d4   : > { %v3463_v62 = vpop.f32.mrf.mxu0 }
 0x1d5   : > { %v3464_v0 = vadd.f32 %v3463_v62, %v3462_v59  ;;  %v3551_v1 = vpop.f32.mrf.mxu1  ;;  %v4830_v3 = vadd.f32 %v3549_v57, %v1885_v18 }
 0x1d6   : > { %v3552_v4 = vadd.f32 %v3551_v1, %v3550_v60  ;;  %v3465_v6 = vpop.f32.mrf.mxu0 }
 0x1d7   : > { %5620 = vst [vmem:[#allocation18_spill] sm:$0xff] %v4830_v3  ;;  %v1890_v25 = vadd.f32 %v3464_v0, %v4778_v39  ;;  %v3553_v7 = vpop.f32.mrf.mxu1 }
 0x1d8   : > { %v3466_v10 = vpop.f32.mrf.mxu0 }
 0x1d9   : > { %v3467_v12 = vadd.f32 %v3466_v10, %v3465_v6  ;;  %v3554_v14 = vpop.f32.mrf.mxu1  ;;  %v4833_v15 = vadd.f32 %v3552_v4, %v1890_v25 }
 0x1da   : > { %v3555_v16 = vadd.f32 %v3554_v14, %v3553_v7  ;;  %v3468_v19 = vpop.f32.mrf.mxu0 }
 0x1db   : > { %v1893_v32 = vadd.f32 %v3467_v12, %v4780_v46  ;;  %v3556_v20 = vpop.f32.mrf.mxu1 }
 0x1dc   : > { %v3469_v23 = vpop.f32.mrf.mxu0 }
 0x1dd   : > { %v3470_v24 = vadd.f32 %v3469_v23, %v3468_v19  ;;  %v3557_v58 = vpop.f32.mrf.mxu1  ;;  %v4836_v26 = vadd.f32 %v3555_v16, %v1893_v32 }
 0x1de   : > { %v3558_v28 = vadd.f32 %v3557_v58, %v3556_v20  ;;  %v3471_v30 = vpop.f32.mrf.mxu0 }
 0x1df   : > { %v1898_v39 = vadd.f32 %v3470_v24, %v4782_v53  ;;  %v3559_v31 = vpop.f32.mrf.mxu1 }
 0x1e0   : > { %v3472_v34 = vpop.f32.mrf.mxu0 }
 0x1e1   : > { %v3473_v35 = vadd.f32 %v3472_v34, %v3471_v30  ;;  %v3560_v2 = vpop.f32.mrf.mxu1  ;;  %v4839_v38 = vadd.f32 %v3558_v28, %v1898_v39 }
 0x1e2   : > { %v3561_v40 = vadd.f32 %v3560_v2, %v3559_v31  ;;  %v3474_v41 = vpop.f32.mrf.mxu0 }
 0x1e3   : > { %5621 = vst [vmem:[#allocation19_spill] sm:$0xff] %v4839_v38  ;;  %v1901_v46 = vadd.f32 %v3473_v35, %v4784_v61  ;;  %v3562_v42 = vpop.f32.mrf.mxu1 }
 0x1e4   : > { %v3475_v44 = vpop.f32.mrf.mxu0 }
 0x1e5   : > { %v3476_v48 = vadd.f32 %v3475_v44, %v3474_v41  ;;  %v3563_v11 = vpop.f32.mrf.mxu1  ;;  %v4842_v49 = vadd.f32 %v3561_v40, %v1901_v46 }
 0x1e6   : > { %v3564_v50 = vadd.f32 %v3563_v11, %v3562_v42  ;;  %v3477_v51 = vpop.f32.mrf.mxu0 }
 0x1e7   : > { %5622 = vst [vmem:[#allocation20_spill] sm:$0xff] %v4842_v49  ;;  %v1906_v53 = vadd.f32 %v3476_v48, %v4786_v5  ;;  %v3565_v52 = vpop.f32.mrf.mxu1 }
 0x1e8   : > { %v3478_v57 = vpop.f32.mrf.mxu0 }
 0x1e9   : > { %v3479_v59 = vadd.f32 %v3478_v57, %v3477_v51  ;;  %v3566_v18 = vpop.f32.mrf.mxu1  ;;  %v4845_v60 = vadd.f32 %v3564_v50, %v1906_v53 }
 0x1ea   : > { %v3567_v62 = vadd.f32 %v3566_v18, %v3565_v52  ;;  %v3480_v0 = vpop.f32.mrf.mxu0 }
 0x1eb   : > { %5623 = vst [vmem:[#allocation21_spill] sm:$0xff] %v4845_v60  ;;  %v1909_v61 = vadd.f32 %v3479_v59, %v4788_v13  ;;  %v3568_v1 = vpop.f32.mrf.mxu1 }
 0x1ec   : > { %v3481_v4 = vpop.f32.mrf.mxu0 }
 0x1ed   : > { %v3569_v6 = vpop.f32.mrf.mxu1  ;;  %v4848_v25 = vadd.f32 %v3567_v62, %v1909_v61  ;;  %v3482_v38 = vadd.f32 %v3481_v4, %v3480_v0 }
 0x1ee   : > { %v3483_v7 = vpop.f32.mrf.mxu0  ;;  %v3570_v0 = vadd.f32 %v3569_v6, %v3568_v1 }
 0x1ef   : > { %5624 = vst [vmem:[#allocation22_spill] sm:$0xff] %v4848_v25  ;;  %v3571_v10 = vpop.f32.mrf.mxu1 }
 0x1f0   : > { %v3484_v12 = vpop.f32.mrf.mxu0 }
 0x1f1   : > { %v3572_v14 = vpop.f32.mrf.mxu1 }
 0x1f2   : > { %v3486_v5 = vpop.f32.mrf.mxu0 }
 0x1f3   : > { %v3574_v16 = vpop.f32.mrf.mxu1 }
 0x1f4   : > { %v3487_v19 = vpop.f32.mrf.mxu0 }
 0x1f5   : > { %v3575_v32 = vpop.f32.mrf.mxu1  ;;  %v3488_v49 = vadd.f32 %v3487_v19, %v3486_v5 }
 0x1f6   : > { %v3489_v20 = vpop.f32.mrf.mxu0  ;;  %v3576_v5 = vadd.f32 %v3575_v32, %v3574_v16  ;;  %v3573_v16 = vadd.f32 %v3572_v14, %v3571_v10  ;;  %v304_v10 = vld [vmem:[%s4559_s0 + $0x18] sm:$0xff] }
 0x1f7   : > { %v3577_v23 = vpop.f32.mrf.mxu1  ;;  %v1922_v3 = vadd.f32 %v3488_v49, %v4794_v37  ;;  %v303_v37 = vld [vmem:[%s4559_s0 + $0x10] sm:$0xff] }
 0x1f8   : > { %v3490_v24 = vpop.f32.mrf.mxu0 }
 0x1f9   : > { %v3578_v58 = vpop.f32.mrf.mxu1 }
 0x1fa   : > { %v3492_v28 = vpop.f32.mrf.mxu0  ;;  %v3579_v1 = vadd.f32 %v3578_v58, %v3577_v23 }
 0x1fb   : > { %v4850_v30 = vpop.f32.mrf.mxu1 }
 0x1fc   : > { %v3493_v13 = vpop.f32.mrf.mxu0 }
 0x1fd   : > { %v4852_v39 = vpop.f32.mrf.mxu1  ;;  %v3494_v6 = vadd.f32 %v3493_v13, %v3492_v28 }
 0x1fe   : > { %v3495_v31 = vpop.f32.mrf.mxu0  ;;  %v3582_v58 = vadd.f32 %v4852_v39, %v4850_v30  ;;  %v302_v30 = vld [vmem:[%s4559_s0 + $0x8] sm:$0xff] }
 0x1ff   : > { %v4854_v34 = vpop.f32.mrf.mxu1 }
 0x200   : > { %v3496_v35 = vpop.f32.mrf.mxu0 }
 0x201   : > { %v4856_v2 = vpop.f32.mrf.mxu1 }
 0x202   : > { %v3498_v40 = vpop.f32.mrf.mxu0 }
 0x203   : > { %v4858_v41 = vpop.f32.mrf.mxu1 }
 0x204   : > { %v3499_v46 = vpop.f32.mrf.mxu0 }
 0x205   : > { %v4860_v42 = vpop.f32.mrf.mxu1 }
 0x206   : > { %v3501_v44 = vpop.f32.mrf.mxu0 }
 0x207   : > { %v4862_v48 = vpop.f32.mrf.mxu1 }
 0x208   : > { %v3502_v11 = vpop.f32.mrf.mxu0 }
 0x209   : > { %v4864_v50 = vpop.f32.mrf.mxu1 }
 0x20a   : > { %v4866_v51 = vpop.f32.mrf.mxu0 }
 0x20b   : > { %v4868_v53 = vpop.f32.mrf.mxu1 }
 0x20c   : > { %5625 = vst [vmem:[#allocation23_spill] sm:$0xff] %v4868_v53  ;;  %v4870_v52 = vpop.f32.mrf.mxu0 }
 0x20d   : > { %v4872_v57 = vpop.f32.mrf.mxu1 }
 0x20e   : > { %5626 = vst [vmem:[#allocation24_spill] sm:$0xff] %v4872_v57  ;;  %v4874_v59 = vpop.f32.mrf.mxu0  ;;  %v3491_v57 = vadd.f32 %v3490_v24, %v3489_v20  ;;  %v2051_v20 = vadd.f32 %v3576_v5, %v1922_v3 }
 0x20f   : > { %v4876_v18 = vpop.f32.mrf.mxu1 }
 0x210   : > { %5627 = vst [vmem:[#allocation25_spill] sm:$0xff] %v4876_v18  ;;  %v4878_v62 = vpop.f32.mrf.mxu0  ;;  %v1914_v18 = vadd.f32 %v3482_v38, %v4790_v21  ;;  %v315_v38 = vld [vmem:[%s4559_s0 + $0x70] sm:$0xff] }
 0x211   : > { %5628 = vst [vmem:[#allocation26_spill] sm:$0xff] %v4878_v62  ;;  %v4880_v61 = vpop.f32.mrf.mxu1  ;;  %v3485_v62 = vadd.f32 %v3484_v12, %v3483_v7 }
 0x212   : > { %5629 = vst [vmem:[#allocation27_spill] sm:$0xff] %v4880_v61  ;;  %v4882_v25 = vpop.f32.mrf.mxu0  ;;  %v2043_v12 = vadd.f32 %v3570_v0, %v1914_v18 }
 0x213   : > { %v4884_v36 = vpop.f32.mrf.mxu1  ;;  %v1917_v24 = vadd.f32 %v3485_v62, %v4792_v29  ;;  %v313_v29 = vld [vmem:[%s4559_s0 + $0x60] sm:$0xff] }
 0x214   : > { %5630 = vst [vmem:[#allocation28_spill] sm:$0xff] %v4884_v36  ;;  %v3511_v60 = vpop.f32.mrf.mxu0  ;;  %v3500_v36 = vadd.f32 %v3499_v46, %v3498_v40  ;;  %v3497_v40 = vadd.f32 %v3496_v35, %v3495_v31  ;;  %v3503_v46 = vadd.f32 %v3502_v11, %v3501_v44 }
 0x215   : > { %v4886_v56 = vpop.f32.mrf.mxu1  ;;  %v2046_v35 = vadd.f32 %v3573_v16, %v1917_v24  ;;  %v305_v16 = vld [vmem:[%s4559_s0 + $0x20] sm:$0xff] }
 0x216   : > { %5631 = vst [vmem:[#allocation29_spill] sm:$0xff] %v4886_v56  ;;  %v4889_v53 = vpop.f32.mrf.mxu0  ;;  %v1925_v56 = vadd.f32 %v3491_v57, %v4796_v45  ;;  %v1933_v11 = vadd.f32 %v3497_v40, %v4800_v63 }
 0x217   : > { %v4892_v61 = vpop.f32.mrf.mxu1 }
 0x218   : > { %v4894_v19 = vpop.f32.mrf.mxu0  ;;  %v2054_v23 = vadd.f32 %v3579_v1, %v1925_v56 }
 0x219   : > { %v4896_v4 = vpop.f32.mrf.mxu1  ;;  %v3515_v40 = vadd.f32 %v4894_v19, %v4889_v53  ;;  %v5633_v53 = vld [vmem:[#allocation26_spill] sm:$0xff] }
 0x21a   : > { %5632 = vst [vmem:[#allocation30_spill] sm:$0xff] %v4896_v4  ;;  %v3642_v49 = vpop.f32.mrf.mxu0  ;;  %v301_v4 = vld [vmem:[%s4559_s0] sm:$0xff]  ;;  %v3509_v19 = vadd.f32 %v5633_v53, %v4874_v59  ;;  %v322_v53 = vld [vmem:[%s4559_s0 + $0xa8] sm:$0xff] }
 0x21b   : > { %v2132_v21 = vadd.f32 %v3642_v49, %v4821_v33  ;;  %v3654_v7 = vpop.f32.mrf.mxu1  ;;  %v1938_v33 = vadd.f32 %v3500_v36, %v4802_v8  ;;  %v1930_v8 = vadd.f32 %v3494_v6, %v4798_v54  ;;  %v3588_v36 = vadd.f32 %v4860_v42, %v4858_v41  ;;  %v314_v54 = vld [vmem:[%s4559_s0 + $0x68] sm:$0xff] }
 0x21c   : > { %v2180_v32 = vadd.f32 %v3654_v7, %v2051_v20  ;;  %v2123_v45 = vpop.f32.mrf.mxu0  ;;  %v3512_v41 = vadd.f32 %v3511_v60, %v4882_v25  ;;  %v307_v20 = vld [vmem:[%s4559_s0 + $0x30] sm:$0xff] }
 0x21d   : > { %v2220_v3 = vadd.f32 %v2132_v21, %v303_v37  ;;  %v2124_v57 = vadd.f32 %v2123_v45, %v4815_v9  ;;  %v2171_v62 = vpop.f32.mrf.mxu1  ;;  %v316_v9 = vld [vmem:[%s4559_s0 + $0x78] sm:$0xff]  ;;  %v2067_v63 = vadd.f32 %v3588_v36, %v1938_v33  ;;  %v3506_v21 = vadd.f32 %v4870_v52, %v4866_v51  ;;  %v319_v60 = vld [vmem:[%s4559_s0 + $0x90] sm:$0xff]  ;;  %v5639_v36 = vld [vmem:[#allocation17_spill] sm:$0xff] }
 0x21e   : > { %v2232_v18 = vadd.f32 %v2180_v32, %v315_v38  ;;  %v2172_v5 = vadd.f32 %v2171_v62, %v2043_v12  ;;  %v3643_v14 = vpop.f32.mrf.mxu0  ;;  %v2059_v6 = vadd.f32 %v3582_v58, %v1930_v8  ;;  %v1954_v45 = vadd.f32 %v3512_v41, %v4810_v47  ;;  %v320_v62 = vld [vmem:[%s4559_s0 + $0x98] sm:$0xff]  ;;  %v318_v8 = vld [vmem:[%s4559_s0 + $0x88] sm:$0xff] }
 0x21f   : > { %2244 = vst [vmem:[%s4559_s0 + $0x10] sm:$0xff] %v2220_v3  ;;  %v2218_v28 = vadd.f32 %v2124_v57, %v301_v4  ;;  %v2135_v13 = vadd.f32 %v3643_v14, %v4824_v43  ;;  %v3655_v31 = vpop.f32.mrf.mxu1  ;;  %v1941_v43 = vadd.f32 %v3503_v46, %v4804_v17  ;;  %v3591_v17 = vadd.f32 %v4864_v50, %v4862_v48  ;;  %v308_v57 = vld [vmem:[%s4559_s0 + $0x38] sm:$0xff] }
 0x220   : > { %2256 = vst [vmem:[%s4559_s0 + $0x70] sm:$0xff] %v2232_v18  ;;  %v2230_v56 = vadd.f32 %v2172_v5, %v313_v29  ;;  %v2183_v44 = vadd.f32 %v3655_v31, %v2054_v23  ;;  %v2126_v39 = vpop.f32.mrf.mxu0  ;;  %v3585_v48 = vadd.f32 %v4856_v2, %v4854_v34  ;;  %v1946_v2 = vadd.f32 %v3506_v21, %v4806_v27  ;;  %v5634_v18 = vld [vmem:[#allocation28_spill] sm:$0xff]  ;;  %v5635_v5 = vld [vmem:[#allocation29_spill] sm:$0xff]  ;;  %v5638_v31 = vld [vmem:[#allocation18_spill] sm:$0xff] }
 0x221   : > { %2242 = vst [vmem:[%s4559_s0] sm:$0xff] %v2218_v28  ;;  %v2221_v0 = vadd.f32 %v2135_v13, %v304_v10  ;;  %v2127_v4 = vadd.f32 %v2126_v39, %v4818_v22  ;;  %v2174_v37 = vpop.f32.mrf.mxu1  ;;  %v2070_v32 = vadd.f32 %v3591_v17, %v1941_v43  ;;  %v3600_v10 = vadd.f32 %v5635_v5, %v5634_v18  ;;  %v306_v27 = vld [vmem:[%s4559_s0 + $0x28] sm:$0xff]  ;;  %v5636_v28 = vld [vmem:[#allocation23_spill] sm:$0xff]  ;;  %v5637_v13 = vld [vmem:[#allocation24_spill] sm:$0xff] }
 0x222   : > { %2254 = vst [vmem:[%s4559_s0 + $0x60] sm:$0xff] %v2230_v56  ;;  %v2233_v42 = vadd.f32 %v2183_v44, %v316_v9  ;;  %v2175_v49 = vadd.f32 %v2174_v37, %v2046_v35  ;;  %v3646_v24 = vpop.f32.mrf.mxu0  ;;  %v2062_v33 = vadd.f32 %v3585_v48, %v1933_v11  ;;  %v1957_v56 = vadd.f32 %v3515_v40, %v5639_v36  ;;  %v311_v39 = vld [vmem:[%s4559_s0 + $0x50] sm:$0xff] }
 0x223   : > { %2245 = vst [vmem:[%s4559_s0 + $0x18] sm:$0xff] %v2221_v0  ;;  %v2219_v22 = vadd.f32 %v2127_v4, %v302_v30  ;;  %v2148_v38 = vadd.f32 %v3646_v24, %v4833_v15  ;;  %v3658_v25 = vpop.f32.mrf.mxu1  ;;  %v317_v15 = vld [vmem:[%s4559_s0 + $0x80] sm:$0xff]  ;;  %v2083_v43 = vadd.f32 %v3600_v10, %v1954_v45  ;;  %v5640_v4 = vld [vmem:[#allocation21_spill] sm:$0xff]  ;;  %v323_v37 = vld [vmem:[%s4559_s0 + $0xb0] sm:$0xff] }
 0x224   : > { %2257 = vst [vmem:[%s4559_s0 + $0x78] sm:$0xff] %v2233_v42  ;;  %v2231_v7 = vadd.f32 %v2175_v49, %v314_v54  ;;  %v2196_v12 = vadd.f32 %v3658_v25, %v2067_v63  ;;  %v2139_v1 = vpop.f32.mrf.mxu0  ;;  %v5641_v49 = vld [vmem:[#allocation16_spill] sm:$0xff]  ;;  %v5642_v24 = vld [vmem:[#allocation30_spill] sm:$0xff]  ;;  %v5643_v25 = vld [vmem:[#allocation19_spill] sm:$0xff] }
 0x225   : > { %2243 = vst [vmem:[%s4559_s0 + $0x8] sm:$0xff] %v2219_v22  ;;  %v2224_v50 = vadd.f32 %v2148_v38, %v307_v20  ;;  %v2140_v51 = vadd.f32 %v2139_v1, %v4827_v55  ;;  %v2187_v52 = vpop.f32.mrf.mxu1  ;;  %v1949_v20 = vadd.f32 %v3509_v19, %v5641_v49  ;;  %v3603_v63 = vadd.f32 %v5642_v24, %v4892_v61  ;;  %v309_v22 = vld [vmem:[%s4559_s0 + $0x40] sm:$0xff]  ;;  %v5644_v1 = vld [vmem:[#allocation25_spill] sm:$0xff]  ;;  %v5646_v45 = vld [vmem:[#allocation22_spill] sm:$0xff] }
 0x226   : > { %2255 = vst [vmem:[%s4559_s0 + $0x68] sm:$0xff] %v2231_v7  ;;  %v2236_v46 = vadd.f32 %v2196_v12, %v319_v60  ;;  %v2188_v3 = vadd.f32 %v2187_v52, %v2059_v6  ;;  %v3647_v34 = vpop.f32.mrf.mxu0  ;;  %v321_v12 = vld [vmem:[%s4559_s0 + $0xa0] sm:$0xff]  ;;  %v5645_v6 = vld [vmem:[#allocation27_spill] sm:$0xff] }
 0x227   : > { %2248 = vst [vmem:[%s4559_s0 + $0x30] sm:$0xff] %v2224_v50  ;;  %v2222_v55 = vadd.f32 %v2140_v51, %v305_v16  ;;  %v2151_v29 = vadd.f32 %v3647_v34, %v4836_v26  ;;  %v3659_v47 = vpop.f32.mrf.mxu1  ;;  %v3594_v26 = vadd.f32 %v5637_v13, %v5636_v28  ;;  %v3597_v48 = vadd.f32 %v5645_v6, %v5644_v1  ;;  %v312_v51 = vld [vmem:[%s4559_s0 + $0x58] sm:$0xff] }
 0x228   : > { %2260 = vst [vmem:[%s4559_s0 + $0x90] sm:$0xff] %v2236_v46  ;;  %v2234_v14 = vadd.f32 %v2188_v3, %v317_v15  ;;  %v2199_v23 = vadd.f32 %v3659_v47, %v2070_v32  ;;  %v2142_v58 = vpop.f32.mrf.mxu0  ;;  %v2086_v52 = vadd.f32 %v3603_v63, %v1957_v56  ;;  %v324_v46 = vld [vmem:[%s4559_s0 + $0xb8] sm:$0xff]  ;;  %v5647_v47 = vld [vmem:[#allocation20_spill] sm:$0xff] }
 0x229   : > { %2246 = vst [vmem:[%s4559_s0 + $0x20] sm:$0xff] %v2222_v55  ;;  %v2225_v9 = vadd.f32 %v2151_v29, %v308_v57  ;;  %v2143_v35 = vadd.f32 %v2142_v58, %v5638_v31  ;;  %v2190_v59 = vpop.f32.mrf.mxu1  ;;  %v2075_v42 = vadd.f32 %v3594_v26, %v1946_v2  ;;  %v310_v2 = vld [vmem:[%s4559_s0 + $0x48] sm:$0xff]  ;;  %v2078_v29 = vadd.f32 %v3597_v48, %v1949_v20 }
 0x22a   : > { %2258 = vst [vmem:[%s4559_s0 + $0x80] sm:$0xff] %v2234_v14  ;;  %v2237_v44 = vadd.f32 %v2199_v23, %v320_v62  ;;  %v2191_v30 = vadd.f32 %v2190_v59, %v2062_v33  ;;  %v3650_v11 = vpop.f32.mrf.mxu0 }
 0x22b   : > { %2249 = vst [vmem:[%s4559_s0 + $0x38] sm:$0xff] %v2225_v9  ;;  %v2223_v0 = vadd.f32 %v2143_v35, %v306_v27  ;;  %v2164_v54 = vadd.f32 %v3650_v11, %v5640_v4  ;;  %v3662_v41 = vpop.f32.mrf.mxu1 }
 0x22c   : > { %2261 = vst [vmem:[%s4559_s0 + $0x98] sm:$0xff] %v2237_v44  ;;  %v2235_v17 = vadd.f32 %v2191_v30, %v318_v8  ;;  %v2212_v21 = vadd.f32 %v3662_v41, %v2083_v43  ;;  %v2155_v38 = vpop.f32.mrf.mxu0 }
 0x22d   : > { %2247 = vst [vmem:[%s4559_s0 + $0x28] sm:$0xff] %v2223_v0  ;;  %v2228_v60 = vadd.f32 %v2164_v54, %v311_v39  ;;  %v2156_v7 = vadd.f32 %v2155_v38, %v5643_v25  ;;  %v2203_v16 = vpop.f32.mrf.mxu1 }
 0x22e   : > { %2259 = vst [vmem:[%s4559_s0 + $0x88] sm:$0xff] %v2235_v17  ;;  %v2240_v61 = vadd.f32 %v2212_v21, %v323_v37  ;;  %v2204_v50 = vadd.f32 %v2203_v16, %v2075_v42  ;;  %v3651_v15 = vpop.f32.mrf.mxu0 }
 0x22f   : > { %2252 = vst [vmem:[%s4559_s0 + $0x50] sm:$0xff] %v2228_v60  ;;  %v2226_v32 = vadd.f32 %v2156_v7, %v309_v22  ;;  %v2167_v40 = vadd.f32 %v3651_v15, %v5646_v45  ;;  %v3663_v3 = vpop.f32.mrf.mxu1 }
 0x230   : > { %2264 = vst [vmem:[%s4559_s0 + $0xb0] sm:$0xff] %v2240_v61  ;;  %v2238_v57 = vadd.f32 %v2204_v50, %v321_v12  ;;  %v2215_v34 = vadd.f32 %v3663_v3, %v2086_v52  ;;  %v2158_v55 = vpop.f32.mrf.mxu0 }
 0x231   : > { %2250 = vst [vmem:[%s4559_s0 + $0x40] sm:$0xff] %v2226_v32  ;;  %v2229_v62 = vadd.f32 %v2167_v40, %v312_v51  ;;  %v2159_v33 = vadd.f32 %v2158_v55, %v5647_v47  ;;  %v2206_v19 = vpop.f32.mrf.mxu1 }
 0x232   : > { %2262 = vst [vmem:[%s4559_s0 + $0xa0] sm:$0xff] %v2238_v57  ;;  %v2241_v18 = vadd.f32 %v2215_v34, %v324_v46  ;;  %v2207_v5 = vadd.f32 %v2206_v19, %v2078_v29  ;;  %2269 = sbr.rel (%p3246_p7) target bundleno = 1116 (0x45c), region = 48 }
 0x233   : > { %2253 = vst [vmem:[%s4559_s0 + $0x58] sm:$0xff] %v2229_v62  ;;  %v2227_v10 = vadd.f32 %v2159_v33, %v310_v2 }
 0x234   : > { %2265 = vst [vmem:[%s4559_s0 + $0xb8] sm:$0xff] %v2241_v18  ;;  %v2239_v14 = vadd.f32 %v2207_v5, %v322_v53 }
 0x235   : > { %2251 = vst [vmem:[%s4559_s0 + $0x48] sm:$0xff] %v2227_v10 }
 0x236   : > { %2263 = vst [vmem:[%s4559_s0 + $0xa8] sm:$0xff] %v2239_v14 }
 0x237   : > { %v4993_v23 = vld [vmem:[%s4559_s0] sm:$0xff]  ;;  %v4996_v27 = vld [vmem:[%s4559_s0 + $0x10] sm:$0xff]  ;;  %v5001_v58 = vld [vmem:[%s4559_s0 + $0x8] sm:$0xff]  ;;  %v5583_v13 = vmov 1   ;;  %v2414_v1 = vlaneseq }
 0x238   : > { %2318 = vadd.xlane.f32.xlu0 %v4993_v23  ;;  %2322 = vadd.xlane.f32.xlu1 %v4996_v27  ;;  %v5004_v28 = vld [vmem:[%s4559_s0 + $0x18] sm:$0xff]  ;;  %v5011_v26 = vld [vmem:[%s4559_s0 + $0x20] sm:$0xff]  ;;  %v5014_v9 = vld [vmem:[%s4559_s0 + $0x28] sm:$0xff] }
 0x239   : > { %4056 = vset.pattern.permute.xlu1 %v5583_v13  ;;  %4057 = vset.pattern.permute.xlu0 %v5583_v13  ;;  %v5019_v31 = vld [vmem:[%s4559_s0 + $0x30] sm:$0xff]  ;;  %v5022_v35 = vld [vmem:[%s4559_s0 + $0x38] sm:$0xff]  ;;  %v5027_v8 = vld [vmem:[%s4559_s0 + $0x40] sm:$0xff]  ;;  %v5138_v6 = vand.u32 127, %v2414_v1 }
 0x23a   : > { %v5035_v36 = vld [vmem:[%s4559_s0 + $0x50] sm:$0xff]  ;;  %v5038_v56 = vld [vmem:[%s4559_s0 + $0x58] sm:$0xff]  ;;  %v5043_v44 = vld [vmem:[%s4559_s0 + $0x60] sm:$0xff] }
 0x23b   : > { %v5046_v30 = vld [vmem:[%s4559_s0 + $0x68] sm:$0xff]  ;;  %v5051_v39 = vld [vmem:[%s4559_s0 + $0x70] sm:$0xff]  ;;  %v5054_v11 = vld [vmem:[%s4559_s0 + $0x78] sm:$0xff]  ;;  %vm2416_vm0 = vcmp.lt.s32.totalorder %v5138_v6, 49 }
 0x23c   : > { %2320 = vadd.xlane.f32.xlu0 %v5001_v58  ;;  %2324 = vadd.xlane.f32.xlu1 %v5004_v28  ;;  %v5030_v59 = vld [vmem:[%s4559_s0 + $0x48] sm:$0xff]  ;;  %v5059_v43 = vld [vmem:[%s4559_s0 + $0x80] sm:$0xff]  ;;  %v5067_v4 = vld [vmem:[%s4559_s0 + $0x90] sm:$0xff] }
 0x23d   : > { %v5062_v0 = vld [vmem:[%s4559_s0 + $0x88] sm:$0xff]  ;;  %v5070_v54 = vld [vmem:[%s4559_s0 + $0x98] sm:$0xff]  ;;  %v5075_v37 = vld [vmem:[%s4559_s0 + $0xa0] sm:$0xff] }
 0x23e   : > { %v5078_v41 = vld [vmem:[%s4559_s0 + $0xa8] sm:$0xff]  ;;  %v5083_v42 = vld [vmem:[%s4559_s0 + $0xb0] sm:$0xff]  ;;  %v5086_v49 = vld [vmem:[%s4559_s0 + $0xb8] sm:$0xff] }
 0x23f   : > { %v5091_v20 = vld [vmem:[%s4557_s30] sm:$0xff]  ;;  %v5095_v24 = vld [vmem:[%s4557_s30 + $0x10] sm:$0xff]  ;;  %v5098_v63 = vld [vmem:[%s4557_s30 + $0x8] sm:$0xff] }
 0x240   : > { %2326 = vadd.xlane.f32.xlu0 %v5011_v26  ;;  %2328 = vadd.xlane.f32.xlu1 %v5014_v9  ;;  %v5102_v17 = vld [vmem:[%s4557_s30 + $0x18] sm:$0xff]  ;;  %v5106_v21 = vld [vmem:[%s4557_s30 + $0x20] sm:$0xff]  ;;  %v5110_v22 = vld [vmem:[%s4557_s30 + $0x28] sm:$0xff] }
 0x241   : > { %v5114_v38 = vld [vmem:[%s4557_s30 + $0x30] sm:$0xff]  ;;  %v5118_v60 = vld [vmem:[%s4557_s30 + $0x38] sm:$0xff]  ;;  %v5122_v25 = vld [vmem:[%s4557_s30 + $0x40] sm:$0xff] }
 0x242   : > { %v5126_v7 = vld [vmem:[%s4557_s30 + $0x48] sm:$0xff]  ;;  %v5130_v12 = vld [vmem:[%s4557_s30 + $0x50] sm:$0xff]  ;;  %v5134_v16 = vld [vmem:[%s4557_s30 + $0x58] sm:$0xff] }
 0x244   : > { %2330 = vadd.xlane.f32.xlu0 %v5019_v31  ;;  %2332 = vadd.xlane.f32.xlu1 %v5022_v35 }
 0x248   : > { %2334 = vadd.xlane.f32.xlu0 %v5027_v8  ;;  %2336 = vadd.xlane.f32.xlu1 %v5030_v59 }
 0x24c   : > { %2338 = vadd.xlane.f32.xlu0 %v5035_v36  ;;  %2340 = vadd.xlane.f32.xlu1 %v5038_v56 }
 0x250   : > { %2342 = vadd.xlane.f32.xlu0 %v5043_v44  ;;  %2344 = vadd.xlane.f32.xlu1 %v5046_v30 }
 0x254   : > { %2346 = vadd.xlane.f32.xlu0 %v5051_v39  ;;  %2348 = vadd.xlane.f32.xlu1 %v5054_v11 }
 0x258   : > { %2350 = vadd.xlane.f32.xlu0 %v5059_v43  ;;  %2352 = vadd.xlane.f32.xlu1 %v5062_v0 }
 0x25c   : > { %2354 = vadd.xlane.f32.xlu0 %v5067_v4  ;;  %2356 = vadd.xlane.f32.xlu1 %v5070_v54 }
 0x260   : > { %2358 = vadd.xlane.f32.xlu0 %v5075_v37  ;;  %2360 = vadd.xlane.f32.xlu1 %v5078_v41 }
 0x264   : > { %2362 = vadd.xlane.f32.xlu0 %v5083_v42  ;;  %2364 = vadd.xlane.f32.xlu1 %v5086_v49 }
 0x275   : > { %2755 = vperm.xlu1 %4056, %v5091_v20  }
 0x279   : > { %2765 = vperm.xlu1 %4056, %v5095_v24  }
 0x27a   : > { %2760 = vperm.xlu0 %4057, %v5098_v63  }
 0x27d   : > { %2770 = vperm.xlu1 %4056, %v5102_v17  }
 0x27e   : > { %2775 = vperm.xlu0 %4057, %v5106_v21  }
 0x281   : > { %2780 = vperm.xlu1 %4056, %v5110_v22  }
 0x282   : > { %2785 = vperm.xlu0 %4057, %v5114_v38  }
 0x285   : > { %2790 = vperm.xlu1 %4056, %v5118_v60  }
 0x286   : > { %2795 = vperm.xlu0 %4057, %v5122_v25  }
 0x289   : > { %2800 = vperm.xlu1 %4056, %v5126_v7  }
 0x28a   : > { %2805 = vperm.xlu0 %4057, %v5130_v12  }
 0x28d   : > { %2810 = vperm.xlu1 %4056, %v5134_v16  }
 0x2c1   : > { %v2319_v48 = vpop.xlane.xlu0 %2318  ;;  %v2323_v61 = vpop.xlane.xlu1 %2322 }
 0x2c2   : > { %v2366_v50 = vmul.f32 0.020408163, %v2319_v48  ;;  %v2368_v51 = vmul.f32 0.020408163, %v2323_v61 }
 0x2c4   : > { %v2390_v15 = vsub.f32 %v4993_v23, %v2366_v50  ;;  %v2392_v52 = vsub.f32 %v4996_v27, %v2368_v51 }
 0x2c5   : > { %v2321_v32 = vpop.xlane.xlu0 %2320  ;;  %v2325_v45 = vpop.xlane.xlu1 %2324 }
 0x2c6   : > { %v2367_v40 = vmul.f32 0.020408163, %v2321_v32  ;;  %v2369_v46 = vmul.f32 0.020408163, %v2325_v45  ;;  %v5145_v3 = vsel %vm2416_vm0, %v2390_v15, 0.0  ;;  %v5149_v57 = vsel %vm2416_vm0, %v2392_v52, 0.0 }
 0x2c7   : > { %v2441_v34 = vmul.f32 %v5145_v3, %v5145_v3  ;;  %v2443_v47 = vmul.f32 %v5149_v57, %v5149_v57 }
 0x2c8   : > { %v2391_v2 = vsub.f32 %v5001_v58, %v2367_v40  ;;  %v2393_v55 = vsub.f32 %v5004_v28, %v2369_v46 }
 0x2c9   : > { %2465 = vadd.xlane.f32.xlu0 %v2441_v34  ;;  %v2327_v29 = vpop.xlane.xlu0 %2326  ;;  %v2329_v62 = vpop.xlane.xlu1 %2328 }
 0x2ca   : > { %v2370_v33 = vmul.f32 0.020408163, %v2327_v29  ;;  %v2371_v53 = vmul.f32 0.020408163, %v2329_v62  ;;  %v5159_v19 = vsel %vm2416_vm0, %v2391_v2, 0.0  ;;  %v5163_v18 = vsel %vm2416_vm0, %v2393_v55, 0.0 }
 0x2cb   : > { %v2442_v5 = vmul.f32 %v5159_v19, %v5159_v19  ;;  %v2444_v58 = vmul.f32 %v5163_v18, %v5163_v18 }
 0x2cc   : > { %v2394_v10 = vsub.f32 %v5011_v26, %v2370_v33  ;;  %v2395_v14 = vsub.f32 %v5014_v9, %v2371_v53 }
 0x2cd   : > { %2469 = vadd.xlane.f32.xlu0 %v2443_v47  ;;  %2467 = vadd.xlane.f32.xlu1 %v2442_v5  ;;  %v2331_v23 = vpop.xlane.xlu0 %2330  ;;  %v2333_v27 = vpop.xlane.xlu1 %2332 }
 0x2ce   : > { %v2372_v28 = vmul.f32 0.020408163, %v2331_v23  ;;  %v2373_v1 = vmul.f32 0.020408163, %v2333_v27  ;;  %v5173_v48 = vsel %vm2416_vm0, %v2394_v10, 0.0  ;;  %v5177_v61 = vsel %vm2416_vm0, %v2395_v14, 0.0 }
 0x2cf   : > { %v2445_v26 = vmul.f32 %v5173_v48, %v5173_v48  ;;  %v2446_v52 = vmul.f32 %v5177_v61, %v5177_v61 }
 0x2d0   : > { %v2396_v9 = vsub.f32 %v5019_v31, %v2372_v28  ;;  %v2397_v50 = vsub.f32 %v5022_v35, %v2373_v1 }
 0x2d1   : > { %2471 = vadd.xlane.f32.xlu1 %v2444_v58  ;;  %2473 = vadd.xlane.f32.xlu0 %v2445_v26  ;;  %v2335_v51 = vpop.xlane.xlu0 %2334  ;;  %v2337_v15 = vpop.xlane.xlu1 %2336 }
 0x2d2   : > { %v2374_v32 = vmul.f32 0.020408163, %v2335_v51  ;;  %v2375_v45 = vmul.f32 0.020408163, %v2337_v15  ;;  %v5187_v40 = vsel %vm2416_vm0, %v2396_v9, 0.0  ;;  %v5191_v46 = vsel %vm2416_vm0, %v2397_v50, 0.0 }
 0x2d3   : > { %v2447_v31 = vmul.f32 %v5187_v40, %v5187_v40  ;;  %v2448_v29 = vmul.f32 %v5191_v46, %v5191_v46 }
 0x2d4   : > { %v2398_v35 = vsub.f32 %v5027_v8, %v2374_v32  ;;  %v2399_v34 = vsub.f32 %v5030_v59, %v2375_v45 }
 0x2d5   : > { %2475 = vadd.xlane.f32.xlu1 %v2446_v52  ;;  %2477 = vadd.xlane.f32.xlu0 %v2447_v31  ;;  %v2339_v2 = vpop.xlane.xlu0 %2338  ;;  %v2341_v55 = vpop.xlane.xlu1 %2340 }
 0x2d6   : > { %v2376_v62 = vmul.f32 0.020408163, %v2339_v2  ;;  %v2377_v47 = vmul.f32 0.020408163, %v2341_v55  ;;  %v5201_v33 = vsel %vm2416_vm0, %v2398_v35, 0.0  ;;  %v5205_v53 = vsel %vm2416_vm0, %v2399_v34, 0.0 }
 0x2d7   : > { %v2449_v8 = vmul.f32 %v5201_v33, %v5201_v33  ;;  %v2450_v23 = vmul.f32 %v5205_v53, %v5205_v53 }
 0x2d8   : > { %v2400_v59 = vsub.f32 %v5035_v36, %v2376_v62  ;;  %v2401_v5 = vsub.f32 %v5038_v56, %v2377_v47 }
 0x2d9   : > { %2479 = vadd.xlane.f32.xlu1 %v2448_v29  ;;  %2481 = vadd.xlane.f32.xlu0 %v2449_v8  ;;  %v2343_v10 = vpop.xlane.xlu0 %2342  ;;  %v2345_v14 = vpop.xlane.xlu1 %2344 }
 0x2da   : > { %v2378_v27 = vmul.f32 0.020408163, %v2343_v10  ;;  %v2379_v58 = vmul.f32 0.020408163, %v2345_v14  ;;  %v5215_v28 = vsel %vm2416_vm0, %v2400_v59, 0.0  ;;  %v5219_v1 = vsel %vm2416_vm0, %v2401_v5, 0.0 }
 0x2db   : > { %5649 = vst [vmem:[#allocation31_spill] sm:$0xff] %v5215_v28  ;;  %v2451_v36 = vmul.f32 %v5215_v28, %v5215_v28  ;;  %v2452_v51 = vmul.f32 %v5219_v1, %v5219_v1 }
 0x2dc   : > { %v2402_v56 = vsub.f32 %v5043_v44, %v2378_v27  ;;  %v2403_v26 = vsub.f32 %v5046_v30, %v2379_v58 }
 0x2dd   : > { %2483 = vadd.xlane.f32.xlu1 %v2450_v23  ;;  %2485 = vadd.xlane.f32.xlu0 %v2451_v36  ;;  %v2347_v9 = vpop.xlane.xlu0 %2346  ;;  %v2349_v50 = vpop.xlane.xlu1 %2348 }
 0x2de   : > { %v2380_v15 = vmul.f32 0.020408163, %v2347_v9  ;;  %v2381_v52 = vmul.f32 0.020408163, %v2349_v50  ;;  %v5229_v32 = vsel %vm2416_vm0, %v2402_v56, 0.0  ;;  %v5233_v45 = vsel %vm2416_vm0, %v2403_v26, 0.0 }
 0x2df   : > { %5650 = vst [vmem:[#allocation32_spill] sm:$0xff] %v5229_v32  ;;  %v2453_v44 = vmul.f32 %v5229_v32, %v5229_v32  ;;  %v2454_v2 = vmul.f32 %v5233_v45, %v5233_v45 }
 0x2e0   : > { %v2404_v30 = vsub.f32 %v5051_v39, %v2380_v15  ;;  %v2405_v31 = vsub.f32 %v5054_v11, %v2381_v52 }
 0x2e1   : > { %2487 = vadd.xlane.f32.xlu1 %v2452_v51  ;;  %2489 = vadd.xlane.f32.xlu0 %v2453_v44  ;;  %v2351_v35 = vpop.xlane.xlu0 %2350  ;;  %v2353_v34 = vpop.xlane.xlu1 %2352 }
 0x2e2   : > { %v2382_v55 = vmul.f32 0.020408163, %v2351_v35  ;;  %v2383_v29 = vmul.f32 0.020408163, %v2353_v34  ;;  %v5243_v62 = vsel %vm2416_vm0, %v2404_v30, 0.0  ;;  %v5247_v47 = vsel %vm2416_vm0, %v2405_v31, 0.0 }
 0x2e3   : > { %5651 = vst [vmem:[#allocation33_spill] sm:$0xff] %v5243_v62  ;;  %5652 = vst [vmem:[#allocation34_spill] sm:$0xff] %v5247_v47  ;;  %v2455_v39 = vmul.f32 %v5243_v62, %v5243_v62  ;;  %v2456_v10 = vmul.f32 %v5247_v47, %v5247_v47 }
 0x2e4   : > { %v2406_v11 = vsub.f32 %v5059_v43, %v2382_v55  ;;  %v2407_v8 = vsub.f32 %v5062_v0, %v2383_v29 }
 0x2e5   : > { %2491 = vadd.xlane.f32.xlu1 %v2454_v2  ;;  %2493 = vadd.xlane.f32.xlu0 %v2455_v39  ;;  %v2355_v59 = vpop.xlane.xlu0 %2354  ;;  %v2357_v5 = vpop.xlane.xlu1 %2356 }
 0x2e6   : > { %v2384_v14 = vmul.f32 0.020408163, %v2355_v59  ;;  %v2385_v23 = vmul.f32 0.020408163, %v2357_v5  ;;  %v5257_v27 = vsel %vm2416_vm0, %v2406_v11, 0.0  ;;  %v5261_v58 = vsel %vm2416_vm0, %v2407_v8, 0.0 }
 0x2e7   : > { %5653 = vst [vmem:[#allocation35_spill] sm:$0xff] %v5257_v27  ;;  %5654 = vst [vmem:[#allocation36_spill] sm:$0xff] %v5261_v58  ;;  %v2457_v43 = vmul.f32 %v5257_v27, %v5257_v27  ;;  %v2458_v9 = vmul.f32 %v5261_v58, %v5261_v58  ;;  %v5303_v11 = vld [vmem:[%s4557_s30 + $0x68] sm:$0xff]  ;;  %v5310_v8 = vld [vmem:[%s4557_s30 + $0x60] sm:$0xff] }
 0x2e8   : > { %v2408_v0 = vsub.f32 %v5067_v4, %v2384_v14  ;;  %v2409_v36 = vsub.f32 %v5070_v54, %v2385_v23  ;;  %v5315_v59 = vld [vmem:[%s4557_s30 + $0x88] sm:$0xff]  ;;  %v5318_v5 = vld [vmem:[%s4557_s30 + $0x70] sm:$0xff]  ;;  %v5326_v14 = vld [vmem:[%s4557_s30 + $0x80] sm:$0xff] }
 0x2e9   : > { %2495 = vadd.xlane.f32.xlu1 %v2456_v10  ;;  %2497 = vadd.xlane.f32.xlu0 %v2457_v43  ;;  %v2359_v56 = vpop.xlane.xlu0 %2358  ;;  %v2361_v26 = vpop.xlane.xlu1 %2360  ;;  %v5323_v10 = vld [vmem:[%s4557_s30 + $0x98] sm:$0xff]  ;;  %v5331_v23 = vld [vmem:[%s4557_s30 + $0xa8] sm:$0xff]  ;;  %v5334_v43 = vld [vmem:[%s4557_s30 + $0x90] sm:$0xff] }
 0x2ea   : > { %v2386_v50 = vmul.f32 0.020408163, %v2359_v56  ;;  %v2387_v51 = vmul.f32 0.020408163, %v2361_v26  ;;  %v5271_v15 = vsel %vm2416_vm0, %v2408_v0, 0.0  ;;  %v5275_v52 = vsel %vm2416_vm0, %v2409_v36, 0.0 }
 0x2eb   : > { %5655 = vst [vmem:[#allocation37_spill] sm:$0xff] %v5271_v15  ;;  %5656 = vst [vmem:[#allocation38_spill] sm:$0xff] %v5275_v52  ;;  %v2459_v4 = vmul.f32 %v5271_v15, %v5271_v15  ;;  %v2460_v31 = vmul.f32 %v5275_v52, %v5275_v52  ;;  %v5339_v0 = vld [vmem:[%s4557_s30 + $0xa0] sm:$0xff]  ;;  %v4325_v36 = vmov 0  }
 0x2ec   : > { %v2410_v54 = vsub.f32 %v5075_v37, %v2386_v50  ;;  %v2411_v44 = vsub.f32 %v5078_v41, %v2387_v51 }
 0x2ed   : > { %2499 = vadd.xlane.f32.xlu1 %v2458_v9  ;;  %2501 = vadd.xlane.f32.xlu0 %v2459_v4  ;;  %v2363_v30 = vpop.xlane.xlu0 %2362  ;;  %v2365_v56 = vpop.xlane.xlu1 %2364 }
 0x2ee   : > { %v2388_v35 = vmul.f32 0.020408163, %v2363_v30  ;;  %v5285_v34 = vsel %vm2416_vm0, %v2410_v54, 0.0  ;;  %v5289_v2 = vsel %vm2416_vm0, %v2411_v44, 0.0  ;;  %v2389_v26 = vmul.f32 0.020408163, %v2365_v56 }
 0x2ef   : > { %5657 = vst [vmem:[#allocation39_spill] sm:$0xff] %v5285_v34  ;;  %5658 = vst [vmem:[#allocation40_spill] sm:$0xff] %v5289_v2  ;;  %v2461_v37 = vmul.f32 %v5285_v34, %v5285_v34  ;;  %v2462_v55 = vmul.f32 %v5289_v2, %v5289_v2 }
 0x2f0   : > { %v2412_v41 = vsub.f32 %v5083_v42, %v2388_v35  ;;  %v5307_v42 = vld [vmem:[%s4557_s30 + $0x78] sm:$0xff]  ;;  %v2413_v50 = vsub.f32 %v5086_v49, %v2389_v26 }
 0x2f1   : > { %2503 = vadd.xlane.f32.xlu1 %v2460_v31  ;;  %2505 = vadd.xlane.f32.xlu0 %v2461_v37  ;;  %v5342_v9 = vpop.permute.xlu1 %2755 }
 0x2f2   : > { %v5298_v29 = vsel %vm2416_vm0, %v2412_v41, 0.0  ;;  %v5351_v54 = vsel %vm2416_vm0, %v2413_v50, 0.0 }
 0x2f3   : > { %5659 = vst [vmem:[#allocation41_spill] sm:$0xff] %v5298_v29  ;;  %v2463_v39 = vmul.f32 %v5298_v29, %v5298_v29  ;;  %5660 = vst [vmem:[#allocation42_spill] sm:$0xff] %v5351_v54  ;;  %v2464_v44 = vmul.f32 %v5351_v54, %v5351_v54 }
 0x2f5   : > { %2507 = vadd.xlane.f32.xlu1 %v2462_v55  ;;  %2509 = vadd.xlane.f32.xlu0 %v2463_v39  ;;  %v5345_v51 = vpop.permute.xlu1 %2765  ;;  %v5347_v4 = vpop.permute.xlu0 %2760 }
 0x2f9   : > { %v5355_v30 = vpop.permute.xlu1 %2770  ;;  %v5357_v31 = vpop.permute.xlu0 %2775 }
 0x2fd   : > { %v5359_v35 = vpop.permute.xlu1 %2780  ;;  %v5361_v37 = vpop.permute.xlu0 %2785 }
 0x301   : > { %v5363_v49 = vpop.permute.xlu1 %2790  ;;  %v5365_v41 = vpop.permute.xlu0 %2795 }
 0x302   : > { %5661 = vst [vmem:[#allocation43_spill] sm:$0xff] %v5365_v41 }
 0x305   : > { %v5367_v55 = vpop.permute.xlu1 %2800  ;;  %v5369_v6 = vpop.permute.xlu0 %2805 }
 0x306   : > { %2820 = vperm.xlu1 %4056, %v5303_v11   ;;  %5662 = vst [vmem:[#allocation44_spill] sm:$0xff] %v5369_v6 }
 0x309   : > { %v5371_v39 = vpop.permute.xlu1 %2810 }
 0x30a   : > { %2830 = vperm.xlu1 %4056, %v5307_v42  }
 0x30b   : > { %2815 = vperm.xlu0 %4057, %v5310_v8  }
 0x30e   : > { %2840 = vperm.xlu1 %4056, %v5315_v59  }
 0x30f   : > { %2825 = vperm.xlu0 %4057, %v5318_v5  }
 0x312   : > { %2850 = vperm.xlu1 %4056, %v5323_v10  }
 0x313   : > { %2835 = vperm.xlu0 %4057, %v5326_v14  }
 0x316   : > { %2860 = vperm.xlu1 %4056, %v5331_v23  }
 0x317   : > { %2845 = vperm.xlu0 %4057, %v5334_v43  }
 0x31a   : > { %4059 = vset.pattern.permute.xlu1 %v4325_v36 }
 0x31b   : > { %2855 = vperm.xlu0 %4057, %v5339_v0  }
 0x31f   : > { %4058 = vset.pattern.permute.xlu0 %v4325_v36 }
 0x33a   : > { %2511 = vadd.xlane.f32.xlu1 %v2464_v44 }
 0x352   : > { %v2466_v36 = vpop.xlane.xlu0 %2465 }
 0x353   : > { %v2513_v56 = vmul.f32 0.020408163, %v2466_v36 }
 0x355   : > { %v2537_v26 = vadd.f32 0.001, %v2513_v56 }
 0x356   : > { %v2468_v50 = vpop.xlane.xlu1 %2467  ;;  %v2470_v44 = vpop.xlane.xlu0 %2469 }
 0x357   : > { %4062 = vrsqrt.f32 %v2537_v26  ;;  %v2514_v13 = vmul.f32 0.020408163, %v2468_v50  ;;  %v2515_v29 = vmul.f32 0.020408163, %v2470_v44 }
 0x359   : > { %v2538_v54 = vadd.f32 0.001, %v2514_v13  ;;  %v2539_v34 = vadd.f32 0.001, %v2515_v29 }
 0x35a   : > { %v2472_v15 = vpop.xlane.xlu1 %2471  ;;  %v2474_v27 = vpop.xlane.xlu0 %2473 }
 0x35b   : > { %4064 = vrsqrt.f32 %v2538_v54  ;;  %v2516_v2 = vmul.f32 0.020408163, %v2472_v15  ;;  %v2517_v62 = vmul.f32 0.020408163, %v2474_v27 }
 0x35c   : > { %4066 = vrsqrt.f32 %v2539_v34 }
 0x35d   : > { %v2540_v52 = vadd.f32 0.001, %v2516_v2  ;;  %v2541_v58 = vadd.f32 0.001, %v2517_v62 }
 0x35e   : > { %v2476_v32 = vpop.xlane.xlu1 %2475  ;;  %v2478_v6 = vpop.xlane.xlu0 %2477 }
 0x35f   : > { %4068 = vrsqrt.f32 %v2540_v52  ;;  %v2518_v36 = vmul.f32 0.020408163, %v2476_v32  ;;  %v2519_v28 = vmul.f32 0.020408163, %v2478_v6 }
 0x360   : > { %4070 = vrsqrt.f32 %v2541_v58 }
 0x361   : > { %v2542_v50 = vadd.f32 0.001, %v2518_v36  ;;  %v2543_v29 = vadd.f32 0.001, %v2519_v28 }
 0x362   : > { %v2480_v56 = vpop.xlane.xlu1 %2479  ;;  %v2482_v41 = vpop.xlane.xlu0 %2481 }
 0x363   : > { %4072 = vrsqrt.f32 %v2542_v50  ;;  %v2520_v34 = vmul.f32 0.020408163, %v2480_v56  ;;  %v2521_v52 = vmul.f32 0.020408163, %v2482_v41 }
 0x364   : > { %v4063_v26 = vpop.eup %4062  ;;  %4074 = vrsqrt.f32 %v2543_v29 }
 0x365   : > { %v2585_v13 = vmul.f32 %v4063_v26, %v5091_v20  ;;  %v2544_v20 = vadd.f32 0.001, %v2520_v34 }
 0x366   : > { %v2484_v44 = vpop.xlane.xlu1 %2483  ;;  %v2486_v54 = vpop.xlane.xlu0 %2485 }
 0x367   : > { %v2522_v15 = vmul.f32 0.020408163, %v2484_v44  ;;  %2611 = vperm.xlu0 %4058, %v2585_v13   ;;  %v2545_v13 = vadd.f32 0.001, %v2521_v52  ;;  %v2523_v47 = vmul.f32 0.020408163, %v2486_v54 }
 0x368   : > { %v4065_v27 = vpop.eup %4064 }
 0x369   : > { %v2546_v2 = vadd.f32 0.001, %v2522_v15  ;;  %v2586_v62 = vmul.f32 %v4065_v27, %v5098_v63  ;;  %v4067_v32 = vpop.eup %4066  ;;  %v2547_v27 = vadd.f32 0.001, %v2523_v47 }
 0x36a   : > { %v2488_v6 = vpop.xlane.xlu1 %2487  ;;  %v2490_v58 = vpop.xlane.xlu0 %2489  ;;  %v2587_v26 = vmul.f32 %v4067_v32, %v5095_v24 }
 0x36b   : > { %4076 = vrsqrt.f32 %v2546_v2  ;;  %v2524_v36 = vmul.f32 0.020408163, %v2488_v6  ;;  %2616 = vperm.xlu1 %4059, %v2586_v62   ;;  %v2525_v2 = vmul.f32 0.020408163, %v2490_v58 }
 0x36c   : > { %v4069_v44 = vpop.eup %4068 }
 0x36d   : > { %v2548_v28 = vadd.f32 0.001, %v2524_v36  ;;  %v4071_v63 = vpop.eup %4070  ;;  %v2588_v29 = vmul.f32 %v4069_v44, %v5102_v17  ;;  %v2549_v6 = vadd.f32 0.001, %v2525_v2 }
 0x36e   : > { %v2492_v50 = vpop.xlane.xlu1 %2491  ;;  %v2494_v56 = vpop.xlane.xlu0 %2493  ;;  %v2589_v24 = vmul.f32 %v4071_v63, %v5106_v21 }
 0x36f   : > { %4078 = vrsqrt.f32 %v2548_v28  ;;  %v2526_v15 = vmul.f32 0.020408163, %v2492_v50  ;;  %2621 = vperm.xlu1 %4059, %v2587_v26   ;;  %v2527_v36 = vmul.f32 0.020408163, %v2494_v56 }
 0x370   : > { %4080 = vrsqrt.f32 %v2544_v20  ;;  %v4073_v52 = vpop.eup %4072 }
 0x371   : > { %v2550_v41 = vadd.f32 0.001, %v2526_v15  ;;  %4082 = vrsqrt.f32 %v2545_v13  ;;  %v4075_v20 = vpop.eup %4074  ;;  %v2590_v44 = vmul.f32 %v4073_v52, %v5110_v22  ;;  %v2551_v13 = vadd.f32 0.001, %v2527_v36 }
 0x372   : > { %v2496_v34 = vpop.xlane.xlu1 %2495  ;;  %v2498_v54 = vpop.xlane.xlu0 %2497  ;;  %v2591_v56 = vmul.f32 %v4075_v20, %v5114_v38 }
 0x373   : > { %4084 = vrsqrt.f32 %v2550_v41  ;;  %v2528_v62 = vmul.f32 0.020408163, %v2496_v34  ;;  %2626 = vperm.xlu1 %4059, %v2588_v29   ;;  %v2529_v21 = vmul.f32 0.020408163, %v2498_v54 }
 0x374   : > { %4086 = vrsqrt.f32 %v2547_v27 }
 0x375   : > { %v2552_v32 = vadd.f32 0.001, %v2528_v62 }
 0x376   : > { %v2500_v28 = vpop.xlane.xlu1 %2499  ;;  %v2502_v15 = vpop.xlane.xlu0 %2501 }
 0x377   : > { %4088 = vrsqrt.f32 %v2552_v32  ;;  %v2530_v26 = vmul.f32 0.020408163, %v2500_v28  ;;  %2631 = vperm.xlu1 %4059, %v2589_v24   ;;  %v2531_v62 = vmul.f32 0.020408163, %v2502_v15 }
 0x378   : > { %v4077_v17 = vpop.eup %4076  ;;  %4090 = vrsqrt.f32 %v2549_v6 }
 0x379   : > { %v2554_v47 = vadd.f32 0.001, %v2530_v26  ;;  %v2594_v58 = vmul.f32 %v4077_v17, %v5126_v7  ;;  %v2553_v7 = vadd.f32 0.001, %v2529_v21 }
 0x37a   : > { %v2504_v50 = vpop.xlane.xlu1 %2503  ;;  %v2506_v32 = vpop.xlane.xlu0 %2505 }
 0x37b   : > { %4092 = vrsqrt.f32 %v2554_v47  ;;  %v2532_v63 = vmul.f32 0.020408163, %v2504_v50  ;;  %2656 = vperm.xlu0 %4058, %v2594_v58   ;;  %2636 = vperm.xlu1 %4059, %v2590_v44   ;;  %v2533_v28 = vmul.f32 0.020408163, %v2506_v32 }
 0x37c   : > { %v4079_v41 = vpop.eup %4078  ;;  %4094 = vrsqrt.f32 %v2551_v13 }
 0x37d   : > { %v2556_v29 = vadd.f32 0.001, %v2532_v63  ;;  %v2596_v27 = vmul.f32 %v4079_v41, %v5134_v16  ;;  %v4081_v2 = vpop.eup %4080  ;;  %v2555_v16 = vadd.f32 0.001, %v2531_v62  ;;  %v2557_v44 = vadd.f32 0.001, %v2533_v28 }
 0x37e   : > { %v2508_v34 = vpop.xlane.xlu1 %2507  ;;  %v4083_v22 = vpop.eup %4082  ;;  %v2592_v38 = vmul.f32 %v4081_v2, %v5118_v60  ;;  %v5663_v62 = vmov 1  }
 0x37f   : > { %4096 = vrsqrt.f32 %v2556_v29  ;;  %v2534_v24 = vmul.f32 0.020408163, %v2508_v34  ;;  %2666 = vperm.xlu0 %4058, %v2596_v27   ;;  %2641 = vperm.xlu1 %4059, %v2591_v56   ;;  %v2593_v20 = vmul.f32 %v4083_v22, %v5122_v25  ;;  %v2510_v47 = vpop.xlane.xlu0 %2509  ;;  %v2316_v34 = vld [vmem:[%s4557_s30 + $0xb0] sm:$0xff] }
 0x380   : > { %v4085_v54 = vpop.eup %4084  ;;  %4098 = vrsqrt.f32 %v2553_v7  ;;  %v2535_v13 = vmul.f32 0.020408163, %v2510_v47 }
 0x381   : > { %v2558_v52 = vadd.f32 0.001, %v2534_v24  ;;  %v2598_v6 = vmul.f32 %v4085_v54, %v5303_v11  ;;  %v4087_v36 = vpop.eup %4086 }
 0x382   : > { %v2595_v60 = vmul.f32 %v4087_v36, %v5130_v12  ;;  %v2559_v15 = vadd.f32 0.001, %v2535_v13  ;;  %v5396_v22 = vpop.permute.xlu1 %2820 }
 0x383   : > { %4100 = vrsqrt.f32 %v2558_v52  ;;  %2676 = vperm.xlu0 %4058, %v2598_v6   ;;  %2646 = vperm.xlu1 %4059, %v2592_v38  }
 0x384   : > { %v4089_v26 = vpop.eup %4088  ;;  %4102 = vrsqrt.f32 %v2555_v16 }
 0x385   : > { %v2600_v17 = vmul.f32 %v4089_v26, %v5307_v42  ;;  %v4091_v58 = vpop.eup %4090  ;;  %4104 = vrsqrt.f32 %v2557_v44 }
 0x386   : > { %v2597_v25 = vmul.f32 %v4091_v58, %v5310_v8  ;;  %4106 = vrsqrt.f32 %v2559_v15  ;;  %v5408_v52 = vpop.permute.xlu0 %2815 }
 0x387   : > { %2686 = vperm.xlu0 %4058, %v2600_v17   ;;  %2651 = vperm.xlu1 %4059, %v2593_v20  }
 0x388   : > { %v4093_v11 = vpop.eup %4092 }
 0x389   : > { %v2602_v21 = vmul.f32 %v4093_v11, %v5315_v59  ;;  %v4095_v50 = vpop.eup %4094 }
 0x38a   : > { %v2599_v12 = vmul.f32 %v4095_v50, %v5318_v5  ;;  %v5410_v38 = vpop.permute.xlu0 %2825 }
 0x38b   : > { %2696 = vperm.xlu0 %4058, %v2602_v21   ;;  %2661 = vperm.xlu1 %4059, %v2595_v60  }
 0x38c   : > { %v4097_v42 = vpop.eup %4096 }
 0x38d   : > { %v2604_v63 = vmul.f32 %v4097_v42, %v5323_v10  ;;  %v4099_v56 = vpop.eup %4098 }
 0x38e   : > { %v2601_v29 = vmul.f32 %v4099_v56, %v5326_v14  ;;  %v5400_v14 = vpop.permute.xlu1 %2830  ;;  %v5412_v36 = vpop.permute.xlu0 %2835 }
 0x38f   : > { %2706 = vperm.xlu0 %4058, %v2604_v63   ;;  %2671 = vperm.xlu1 %4059, %v2597_v25  }
 0x390   : > { %v4101_v41 = vpop.eup %4100 }
 0x391   : > { %v2606_v59 = vmul.f32 %v4101_v41, %v5331_v23  ;;  %v4103_v27 = vpop.eup %4102  ;;  %v2317_v23 = vld [vmem:[%s4557_s30 + $0xb8] sm:$0xff] }
 0x392   : > { %v2603_v8 = vmul.f32 %v4103_v27, %v5334_v43  ;;  %v4105_v10 = vpop.eup %4104  ;;  %v5402_v24 = vpop.permute.xlu1 %2840 }
 0x393   : > { %2716 = vperm.xlu0 %4058, %v2606_v59   ;;  %2681 = vperm.xlu1 %4059, %v2599_v12   ;;  %v2605_v2 = vmul.f32 %v4105_v10, %v5339_v0  ;;  %v4107_v7 = vpop.eup %4106  ;;  %v5414_v20 = vpop.permute.xlu0 %2845  ;;  %v5665_v10 = vld [vmem:[#allocation43_spill] sm:$0xff] }
 0x394   : > { %v2607_v5 = vmul.f32 %v4107_v7, %v2316_v34 }
 0x396   : > { %v5404_v43 = vpop.permute.xlu1 %2850 }
 0x397   : > { %2691 = vperm.xlu1 %4059, %v2601_v29   ;;  %v5417_v26 = vpop.permute.xlu0 %2855 }
 0x39a   : > { %v5406_v54 = vpop.permute.xlu1 %2860 }
 0x39b   : > { %2701 = vperm.xlu1 %4059, %v2603_v8  }
 0x39f   : > { %2711 = vperm.xlu1 %4059, %v2605_v2  }
 0x3a3   : > { %2721 = vperm.xlu1 %4059, %v2607_v5   ;;  %v5667_v5 = vld [vmem:[#allocation36_spill] sm:$0xff] }
 0x3a7   : > { %4061 = vset.pattern.permute.xlu1 %v5663_v62 }
 0x3a8   : > { %2870 = vperm.xlu1 %4061, %v2317_v23  }
 0x3c3   : > { %v2512_v0 = vpop.xlane.xlu1 %2511 }
 0x3c4   : > { %v2536_v32 = vmul.f32 0.020408163, %v2512_v0 }
 0x3c6   : > { %v2560_v6 = vadd.f32 0.001, %v2536_v32 }
 0x3c8   : > { %4108 = vrsqrt.f32 %v2560_v6 }
 0x3d5   : > { %v4109_v16 = vpop.eup %4108 }
 0x3d6   : > { %v2608_v28 = vmul.f32 %v4109_v16, %v2317_v23  ;;  %v5668_v23 = vld [vmem:[#allocation44_spill] sm:$0xff]  ;;  %v5670_v16 = vld [vmem:[#allocation38_spill] sm:$0xff] }
 0x3d8   : > { %2726 = vperm.xlu0 %4058, %v2608_v28  }
 0x3dc   : > { %4060 = vset.pattern.permute.xlu0 %v5663_v62 }
 0x3dd   : > { %2865 = vperm.xlu0 %4060, %v2316_v34  }
 0x3e2   : > { %v2612_v17 = vpop.permute.xlu0 %2611 }
 0x3e3   : > { %v2729_v47 = vmul.f32 %v2612_v17, %v5145_v3 }
 0x3e5   : > { %v2873_v58 = vadd.f32 %v5342_v9, %v2729_v47 }
 0x3e6   : > { %v2617_v44 = vpop.permute.xlu1 %2616 }
 0x3e7   : > { %2897 = vst [vmem:[%s4559_s0] sm:$0xff] %v2873_v58  ;;  %v2730_v13 = vmul.f32 %v2617_v44, %v5159_v19 }
 0x3e9   : > { %v2874_v60 = vadd.f32 %v5347_v4, %v2730_v13 }
 0x3ea   : > { %v2622_v11 = vpop.permute.xlu1 %2621 }
 0x3eb   : > { %2898 = vst [vmem:[%s4559_s0 + $0x8] sm:$0xff] %v2874_v60  ;;  %v2731_v21 = vmul.f32 %v2622_v11, %v5149_v57  ;;  %v5672_v60 = vld [vmem:[#allocation40_spill] sm:$0xff] }
 0x3ed   : > { %v2875_v50 = vadd.f32 %v5345_v51, %v2731_v21 }
 0x3ee   : > { %v2627_v15 = vpop.permute.xlu1 %2626 }
 0x3ef   : > { %2899 = vst [vmem:[%s4559_s0 + $0x10] sm:$0xff] %v2875_v50  ;;  %v2732_v3 = vmul.f32 %v2627_v15, %v5163_v18 }
 0x3f1   : > { %v2876_v9 = vadd.f32 %v5355_v30, %v2732_v3 }
 0x3f2   : > { %v2632_v25 = vpop.permute.xlu1 %2631 }
 0x3f3   : > { %2900 = vst [vmem:[%s4559_s0 + $0x18] sm:$0xff] %v2876_v9  ;;  %v2733_v19 = vmul.f32 %v2632_v25, %v5173_v48  ;;  %v5674_v25 = vld [vmem:[#allocation37_spill] sm:$0xff] }
 0x3f5   : > { %v2877_v4 = vadd.f32 %v5357_v31, %v2733_v19 }
 0x3f6   : > { %v2637_v42 = vpop.permute.xlu1 %2636  ;;  %v2657_v63 = vpop.permute.xlu0 %2656 }
 0x3f7   : > { %2901 = vst [vmem:[%s4559_s0 + $0x20] sm:$0xff] %v2877_v4  ;;  %v2734_v57 = vmul.f32 %v2637_v42, %v5177_v61  ;;  %v2738_v51 = vmul.f32 %v2657_v63, %v5205_v53 }
 0x3f9   : > { %v2878_v18 = vadd.f32 %v5359_v35, %v2734_v57  ;;  %v2882_v56 = vadd.f32 %v5367_v55, %v2738_v51 }
 0x3fa   : > { %v2642_v30 = vpop.permute.xlu1 %2641  ;;  %v2667_v12 = vpop.permute.xlu0 %2666 }
 0x3fb   : > { %2902 = vst [vmem:[%s4559_s0 + $0x28] sm:$0xff] %v2878_v18  ;;  %2906 = vst [vmem:[%s4559_s0 + $0x48] sm:$0xff] %v2882_v56  ;;  %v2735_v48 = vmul.f32 %v2642_v30, %v5187_v40  ;;  %v2740_v31 = vmul.f32 %v2667_v12, %v5219_v1  ;;  %v5676_v56 = vld [vmem:[#allocation42_spill] sm:$0xff]  ;;  %v5677_v12 = vld [vmem:[#allocation41_spill] sm:$0xff] }
 0x3fd   : > { %v2879_v41 = vadd.f32 %v5361_v37, %v2735_v48  ;;  %v2884_v61 = vadd.f32 %v5371_v39, %v2740_v31  ;;  %v5664_v39 = vld [vmem:[#allocation34_spill] sm:$0xff] }
 0x3fe   : > { %v2647_v59 = vpop.permute.xlu1 %2646  ;;  %v2677_v53 = vpop.permute.xlu0 %2676 }
 0x3ff   : > { %2903 = vst [vmem:[%s4559_s0 + $0x30] sm:$0xff] %v2879_v41  ;;  %2908 = vst [vmem:[%s4559_s0 + $0x58] sm:$0xff] %v2884_v61  ;;  %v2736_v35 = vmul.f32 %v2647_v59, %v5191_v46  ;;  %v2742_v55 = vmul.f32 %v2677_v53, %v5233_v45 }
 0x401   : > { %v2880_v29 = vadd.f32 %v5363_v49, %v2736_v35  ;;  %v2886_v40 = vadd.f32 %v5396_v22, %v2742_v55  ;;  %v5666_v49 = vld [vmem:[#allocation31_spill] sm:$0xff] }
 0x402   : > { %v2652_v27 = vpop.permute.xlu1 %2651  ;;  %v2687_v1 = vpop.permute.xlu0 %2686 }
 0x403   : > { %2904 = vst [vmem:[%s4559_s0 + $0x38] sm:$0xff] %v2880_v29  ;;  %2910 = vst [vmem:[%s4559_s0 + $0x68] sm:$0xff] %v2886_v40  ;;  %v2737_v37 = vmul.f32 %v2652_v27, %v5201_v33  ;;  %v2744_v8 = vmul.f32 %v2687_v1, %v5664_v39 }
 0x405   : > { %v2881_v2 = vadd.f32 %v5665_v10, %v2737_v37  ;;  %v2888_v46 = vadd.f32 %v5400_v14, %v2744_v8  ;;  %v5669_v14 = vld [vmem:[#allocation32_spill] sm:$0xff] }
 0x406   : > { %v2662_v7 = vpop.permute.xlu1 %2661  ;;  %v2697_v45 = vpop.permute.xlu0 %2696 }
 0x407   : > { %2905 = vst [vmem:[%s4559_s0 + $0x40] sm:$0xff] %v2881_v2  ;;  %2912 = vst [vmem:[%s4559_s0 + $0x78] sm:$0xff] %v2888_v46  ;;  %v2739_v34 = vmul.f32 %v2662_v7, %v5666_v49  ;;  %v2746_v22 = vmul.f32 %v2697_v45, %v5667_v5 }
 0x409   : > { %v2883_v62 = vadd.f32 %v5668_v23, %v2739_v34  ;;  %v2890_v33 = vadd.f32 %v5402_v24, %v2746_v22  ;;  %v5671_v24 = vld [vmem:[#allocation33_spill] sm:$0xff] }
 0x40a   : > { %v2672_v0 = vpop.permute.xlu1 %2671  ;;  %v2707_v32 = vpop.permute.xlu0 %2706 }
 0x40b   : > { %2907 = vst [vmem:[%s4559_s0 + $0x50] sm:$0xff] %v2883_v62  ;;  %2914 = vst [vmem:[%s4559_s0 + $0x88] sm:$0xff] %v2890_v33  ;;  %v2741_v6 = vmul.f32 %v2672_v0, %v5669_v14  ;;  %v2748_v28 = vmul.f32 %v2707_v32, %v5670_v16 }
 0x40d   : > { %v2885_v17 = vadd.f32 %v5408_v52, %v2741_v6  ;;  %v2892_v47 = vadd.f32 %v5404_v43, %v2748_v28  ;;  %v5673_v52 = vld [vmem:[#allocation35_spill] sm:$0xff] }
 0x40e   : > { %v2682_v58 = vpop.permute.xlu1 %2681  ;;  %v2717_v44 = vpop.permute.xlu0 %2716 }
 0x40f   : > { %2909 = vst [vmem:[%s4559_s0 + $0x60] sm:$0xff] %v2885_v17  ;;  %2916 = vst [vmem:[%s4559_s0 + $0x98] sm:$0xff] %v2892_v47  ;;  %v2743_v13 = vmul.f32 %v2682_v58, %v5671_v24  ;;  %v2750_v11 = vmul.f32 %v2717_v44, %v5672_v60 }
 0x411   : > { %v2887_v21 = vadd.f32 %v5410_v38, %v2743_v13  ;;  %v2894_v50 = vadd.f32 %v5406_v54, %v2750_v11  ;;  %v5675_v38 = vld [vmem:[#allocation39_spill] sm:$0xff] }
 0x412   : > { %v2692_v15 = vpop.permute.xlu1 %2691 }
 0x413   : > { %2911 = vst [vmem:[%s4559_s0 + $0x70] sm:$0xff] %v2887_v21  ;;  %2918 = vst [vmem:[%s4559_s0 + $0xa8] sm:$0xff] %v2894_v50  ;;  %v2745_v3 = vmul.f32 %v2692_v15, %v5673_v52 }
 0x415   : > { %v2889_v43 = vadd.f32 %v5412_v36, %v2745_v3 }
 0x416   : > { %v2702_v9 = vpop.permute.xlu1 %2701 }
 0x417   : > { %2913 = vst [vmem:[%s4559_s0 + $0x80] sm:$0xff] %v2889_v43  ;;  %v2747_v19 = vmul.f32 %v2702_v9, %v5674_v25 }
 0x419   : > { %v2891_v4 = vadd.f32 %v5414_v20, %v2747_v19 }
 0x41a   : > { %v2712_v42 = vpop.permute.xlu1 %2711 }
 0x41b   : > { %2915 = vst [vmem:[%s4559_s0 + $0x90] sm:$0xff] %v2891_v4  ;;  %v2749_v63 = vmul.f32 %v2712_v42, %v5675_v38 }
 0x41d   : > { %v2893_v54 = vadd.f32 %v5417_v26, %v2749_v63 }
 0x41e   : > { %v2722_v57 = vpop.permute.xlu1 %2721 }
 0x41f   : > { %2917 = vst [vmem:[%s4559_s0 + $0xa0] sm:$0xff] %v2893_v54  ;;  %v2751_v48 = vmul.f32 %v2722_v57, %v5677_v12 }
 0x423   : > { %v2871_v18 = vpop.permute.xlu1 %2870 }
 0x453   : > { %v2727_v51 = vpop.permute.xlu0 %2726 }
 0x454   : > { %v2752_v36 = vmul.f32 %v2727_v51, %v5676_v56 }
 0x456   : > { %v2896_v30 = vadd.f32 %v2871_v18, %v2752_v36 }
 0x458   : > { %2920 = vst [vmem:[%s4559_s0 + $0xb8] sm:$0xff] %v2896_v30  ;;  %v2866_v31 = vpop.permute.xlu0 %2865 }
 0x459   : > { %v2895_v41 = vadd.f32 %v2866_v31, %v2751_v48 }
 0x45b   : > { %2919 = vst [vmem:[%s4559_s0 + $0xb0] sm:$0xff] %v2895_v41 }
 0x45c PF: > { %s5678_s24 = sld [smem:[#allocation12_spill]]  ;;  %s2935_s21 = sshll.u32 %s4559_s0, 4  ;;  %s5496_s21 = int_to_ptr.vmem [resolvable:$true] %s2935_s21 }
 0x45d   : > { %s5679_s15 = sld [smem:[#allocation47_spill]]  ;;  %s5500_s28 = scalar_lea.sflag [#allocation4], %s259_s11 }
 0x45e   : > { %s4166_s26 = scalar_lea.vmem %s5496_s21, 3072  ;;  %s4326_s4 = smov [#allocation7]  }
 0x45f   : > { %p4167_p11 = scmp.ne.s32.totalorder %s5496_s21, %s4166_s26  ;;  %s4170_s30 = sshll.u32 %s4326_s4, 4  ;;  %s4171_s30 = int_to_ptr.vmem [resolvable:$false] %s4170_s30 }
 0x460   : > { %s4172_s0 = scalar_lea.vmem %s4171_s30, 6144  ;;  %p4173_p3 = scmp.lt.s32.totalorder %s5496_s21, %s4171_s30 }
 0x461   : > { %p4168_p9 = pnand %p4167_p11, %p4509_p8  ;;  %p4174_p4 = scmp.lt.s32.totalorder %s4172_s0, %s4166_s26 }
 0x462   : > { %s3251_s22 = smul.u32 3072, %s5678_s24 }
 0x463   : > { %s5680_s7 = smov %s5679_s15  ;;  %p4169_p1 = pneg %p4168_p9 }
 0x464   : > { %s5494_s3 = scalar_lea.hbm %s5679_s15, %s3251_s22  ;;  %p4175_p5 = por %p4174_p4, %p4173_p3 }
 0x466   : > { %p4176_p6 = pnand %p4175_p5, %p4169_p1 }
 0x468   : > { %4179 = shalt.err (!%p4176_p6)
}
 0x469   : > { %s4180_s11 = scalar_lea.hbm %s5494_s3, 3072  ;;  %s4184_s24 = scalar_lea.hbm %s5680_s7, 6144 }
 0x46a   : > { %p4181_p0 = scmp.ne.s32.totalorder %s5494_s3, %s4180_s11  ;;  %p4185_p13 = scmp.lt.s32.totalorder %s5494_s3, %s5680_s7 }
 0x46b   : > { %p4186_p7 = scmp.lt.s32.totalorder %s4184_s24, %s4180_s11 }
 0x46c   : > { %p4182_p12 = pnand %p4181_p0, %p4509_p8 }
 0x46d   : > { %p4187_p11 = por %p4186_p7, %p4185_p13 }
 0x46e   : > { %p4183_p10 = pneg %p4182_p12 }
 0x470   : > { %p4188_p9 = pnand %p4187_p11, %p4183_p10 }
 0x472   : > { %4191 = shalt.err (!%p4188_p9)
}
 0x473   : > { %s4327_s27 = smov 128   ;;  %s4328_s15 = smov 8  }
 0x474   : > { %3690 = dma.vmem_to_hbm [thread:$0]  (%p4509_p8), %s5496_s21, 3072, %s5494_s3, %s5500_s28, %s4327_s27, %s4327_s27, %s4328_s15  }
 0x475 PF: > { %p3705_p1 = scmp.ge.s32.totalorder %s4314_s25, 2  ;;  %s2950_s26 = sand.u32 1, %s4262_s12  }
 0x476   : > { %s2951_s4 = scalar_lea.sflag [#allocation4], %s2950_s26 }
 0x477   : > { %p3700_p3 = pnand %p3705_p1, %p4515_p2 }
 0x479   : > { %p3701_p4 = pneg %p3700_p3 }
 0x47b   : > { %4257 = dma.done.wait (%p3701_p4), %s2951_s4, 3072  }
 0x47c   : > { %4259 = vsyncadd (%p3701_p4), %s2951_s4, 4294964224  ;;  %s22_s25 = sadd.s32 1, %s4314_s25   ;;  %s5682_s22 = sld [smem:[#allocation13_spill]] }
 0x47d   : > { %p5528_p5 = scmp.ge.s32.totalorder %s22_s25, 6   ;;  %s5683_s8 = sld [smem:[#allocation14_spill]] }
 0x47e   : > { %s5684_s24 = sld [smem:[#allocation15_spill]]  ;;  %s5685_s12 = smov %s4266_s13 }
 0x47f   : > { %s5686_s13 = smov %s4270_s14  ;;  %s5687_s14 = smov %s4449_s9 }
 0x480   : > { %s5688_s15 = smov %s4278_s16  ;;  %s5689_s16 = smov %s4282_s17 }
 0x481   : > { %s5690_s17 = smov %s4491_s2  ;;  %s5691_s18 = smov %s4290_s19 }
 0x482   : > { %s5692_s19 = smov %s4294_s20  ;;  %s5693_s20 = smov %s4452_s10 }
 0x483   : > { %s5694_s21 = smov %s4306_s23  ;;  %s5695_s23 = smov %s5683_s8 }
 0x484   :  { %21 = sbr.rel (!%p5528_p5) target bundleno = 16 (0x10), region = 101 }
 0x489   :  { %2956 = vsyncpa [#allocation3], 1 }
 0x48a   :  { %2958 = vsyncpa [#allocation3 + $0x1], 1 }
 0x48b   :  { %2959 = vsyncpa [#allocation6], 1 }
 0x48c   :  { %2961 = vsyncpa [#allocation6 + $0x1], 1 }
 0x48d   :  { %2962 = vsyncpa [#allocation4], 1 }
 0x48e   :  { %2964 = vsyncpa [#allocation4 + $0x1], 1 }

</bundles_post_ra>
